<compile_context>
chip_gen: v7x
topology: tpu7x:2x2x1
jax: 0.10.0
libtpu: 0.0.40
codegen_flags: <defaults>
</compile_context>

<pallas_src>
import functools
import numpy as np

import jax
import jax.numpy as jnp
from jax import lax
from jax.experimental import pallas as pl
from jax.experimental.pallas import tpu as pltpu

# ----------------- TorchGate.__init__ equivalent configuration ----------------
SR = 8000
N_FFT = 128
WIN_LENGTH = N_FFT                      # win_length = n_fft
HOP = WIN_LENGTH // 4                   # hop_length = win_length // 4 (= 32)
N_CHUNKS = N_FFT // HOP                 # 4 hop blocks per frame
N_STD_THRESH = 1.5                      # n_std_thresh_stationary
PROP_DECREASE = 1.0
FREQ_MASK_SMOOTH_HZ = 250.0
TIME_MASK_SMOOTH_MS = 12.0
TOP_DB = 40.0
EPS = float(np.finfo(np.float64).eps)   # torch.finfo(torch.float64).eps
N_FREQ = N_FFT // 2 + 1                 # onesided rfft bins (65)
F_PAD = 128                             # freq axis padded to a full lane tile


def _round_up(x, m):
    return (x + m - 1) // m * m


# ----------------------- deterministic parameter setup ------------------------
def _linspace(start, stop, num, endpoint=True):
    if endpoint:
        return np.linspace(start, stop, num, dtype=np.float64)
    return np.linspace(start, stop, num + 1, dtype=np.float64)[:-1]


def make_smoothing_vectors():
    """Separable factors of TorchGate._generate_mask_smoothing_filter.

    outer(v_f, v_t) / sum == outer(v_f / sum(v_f), v_t / sum(v_t)); both
    vectors are symmetric so correlation == convolution.
    """
    n_grad_freq = int(FREQ_MASK_SMOOTH_HZ / (SR / (N_FFT / 2)))
    n_grad_time = int(TIME_MASK_SMOOTH_MS / (HOP / SR * 1000))
    assert n_grad_freq >= 1 and n_grad_time >= 1
    v_f = np.concatenate([_linspace(0, 1, n_grad_freq + 1, endpoint=False),
                          _linspace(1, 0, n_grad_freq + 2)])[1:-1]
    v_t = np.concatenate([_linspace(0, 1, n_grad_time + 1, endpoint=False),
                          _linspace(1, 0, n_grad_time + 2)])[1:-1]
    return v_f / v_f.sum(), v_t / v_t.sum()


def make_hann_window():
    # torch.hann_window(win_length)  (periodic=True)
    n = np.arange(WIN_LENGTH, dtype=np.float64)
    return 0.5 * (1.0 - np.cos(2.0 * np.pi * n / WIN_LENGTH))


def make_dft_matrices():
    """Window-folded, lane-padded forward/inverse real-DFT matrices.

    Forward: (N_FFT, 2*F_PAD) = [hann*cos | -hann*sin], freq padded 65 -> 128.
    Inverse: (2*F_PAD, N_FFT) = [c_k*cos/N * hann ; -c_k*sin/N * hann].
    """
    hann = make_hann_window()
    n = np.arange(N_FFT, dtype=np.float64)
    k = np.arange(N_FREQ, dtype=np.float64)

    ang = 2.0 * np.pi * np.outer(n, k) / N_FFT            # (N, F)
    cos_f = hann[:, None] * np.cos(ang)                   # Re = frames @ cos_f
    sin_f = hann[:, None] * (-np.sin(ang))                # Im = frames @ sin_f
    fwd = np.zeros((N_FFT, 2 * F_PAD), np.float32)
    fwd[:, :N_FREQ] = cos_f
    fwd[:, F_PAD:F_PAD + N_FREQ] = sin_f

    # inverse (irfft): frame[n] = sum_k c_k/N * (Re_k cos - Im_k sin), then *hann
    ck = np.ones(N_FREQ, dtype=np.float64)
    ck[1:-1] = 2.0
    angi = 2.0 * np.pi * np.outer(k, n) / N_FFT           # (F, N)
    icos = (ck[:, None] * np.cos(angi) / N_FFT) * hann[None, :]
    isin = (-(ck[:, None]) * np.sin(angi) / N_FFT) * hann[None, :]
    inv = np.zeros((2 * F_PAD, N_FFT), np.float32)
    inv[:N_FREQ, :] = icos
    inv[F_PAD:F_PAD + N_FREQ, :] = isin
    return fwd, inv, hann


V_F, V_T = make_smoothing_vectors()                        # (5,), (7,)
DFT_FWD_NP, DFT_INV_NP, HANN_NP = make_dft_matrices()


# ------------------------------- fused Pallas kernel ---------------------------
def _torch_gate_kernel(sig_ref, fwd_ref, inv_ref, out_ref, *, n_frames, v_f, v_t):
    """One batch element: STFT -> stationary mask -> smoothing -> masked iSTFT.

    sig_ref : (1, R, HOP)      hop blocks of the center-padded signal
    fwd_ref : (N_FFT, 2*F_PAD) hann-folded forward DFT ([Re|Im], freq padded)
    inv_ref : (2*F_PAD, N_FFT) hann-folded inverse DFT
    out_ref : (1, R, N_FFT)    windowed synthesis frames (rows >= n_frames are 0)

    R >= n_frames + 3 and R % 8 == 0, so sublane rolls by up to +-3 only wrap
    through rows that are forced to zero (they play the role of the conv2d
    'same' zero padding in time).
    """
    blocks = sig_ref[0]                                    # (R, HOP)
    r = blocks.shape[0]
    fwd = fwd_ref[...]
    inv = inv_ref[...]

    # --- STFT: framing folded into 4 hop-shifted MXU matmuls -----------------
    # frame[t] = concat(blocks[t], blocks[t+1], blocks[t+2], blocks[t+3])
    # => spec[t] = sum_j blocks[t+j] @ fwd[j*HOP:(j+1)*HOP]
    spec = jnp.dot(blocks, fwd[:HOP, :], preferred_element_type=jnp.float32)
    for j in range(1, N_CHUNKS):
        shifted = pltpu.roll(blocks, shift=r - j, axis=0)  # row t -> blocks[t+j]
        spec = spec + jnp.dot(shifted, fwd[j * HOP:(j + 1) * HOP, :],
                              preferred_element_type=jnp.float32)

    re = spec[:, :F_PAD]                                   # (R, F_PAD)
    im = spec[:, F_PAD:]

    row = lax.broadcasted_iota(jnp.int32, (r, F_PAD), 0)
    lane = lax.broadcasted_iota(jnp.int32, (r, F_PAD), 1)
    row_ok = row < n_frames                                # real time frames
    freq_ok = lane < N_FREQ                                # real rfft bins

    # --- amp_to_db: 20*log10(|X| + eps), per-freq top_db clamp over time -----
    mag = jnp.sqrt(re * re + im * im)
    x_db = 20.0 * jnp.log10(mag + EPS)
    peak = jnp.max(jnp.where(row_ok, x_db, -1e30), axis=0, keepdims=True)
    x_db = jnp.maximum(x_db, peak - TOP_DB)

    # --- stationary threshold (unbiased std over time, per frequency) --------
    mean = jnp.sum(jnp.where(row_ok, x_db, 0.0), axis=0, keepdims=True) / n_frames
    dev = jnp.where(row_ok, x_db - mean, 0.0)
    var = jnp.sum(dev * dev, axis=0, keepdims=True) / (n_frames - 1)
    thresh = mean + jnp.sqrt(var) * N_STD_THRESH
    sig = (x_db > thresh).astype(jnp.float32)
    m = PROP_DECREASE * (sig - 1.0) + 1.0
    # Zero padded rows / bins so the rolls below reproduce conv2d zero padding.
    m = jnp.where(row_ok & freq_ok, m, 0.0)

    # --- separable mask smoothing: freq (lane rolls) then time (sublane rolls)
    kf = len(v_f)
    sm = jnp.zeros_like(m)
    for i in range(kf):
        s = (kf // 2 - i) % F_PAD
        sm = sm + float(v_f[i]) * (m if s == 0 else pltpu.roll(m, shift=s, axis=1))
    kt = len(v_t)
    sm2 = jnp.zeros_like(sm)
    for i in range(kt):
        s = (kt // 2 - i) % r
        sm2 = sm2 + float(v_t[i]) * (sm if s == 0 else pltpu.roll(sm, shift=s, axis=0))
    mask = jnp.where(row_ok, sm2, 0.0)     # re-zero rows polluted by roll wrap

    # --- apply mask + iSTFT synthesis frames (Re/Im halves, no [m|m] concat) --
    out = (jnp.dot(re * mask, inv[:F_PAD, :], preferred_element_type=jnp.float32) +
           jnp.dot(im * mask, inv[F_PAD:, :], preferred_element_type=jnp.float32))
    out_ref[...] = out[None, :, :]


# ------------------------------ TorchGate.forward -------------------------------
def torch_gate_forward(x):
    """x: (batch, signal_length) float32 -> denoised (batch, hop*(T-1)) float32."""
    b, length = x.shape
    assert x.ndim == 2 and length >= 2 * WIN_LENGTH

    pad = N_FFT // 2                                        # center padding (64)
    t = 1 + length // HOP                                   # STFT frames
    r = _round_up(t + 3, 8)                                 # kernel rows (frames + halo)
    total = r * HOP
    # center=True, pad_mode='constant'; right padding sized so frames fit exactly.
    xp = jnp.pad(x, ((0, 0), (pad, total - pad - length)))
    sig_blocks = xp.reshape(b, r, HOP)                      # hop blocks, no gather

    frames_out = pl.pallas_call(
        functools.partial(_torch_gate_kernel, n_frames=t,
                          v_f=tuple(V_F.tolist()), v_t=tuple(V_T.tolist())),
        out_shape=jax.ShapeDtypeStruct((b, r, N_FFT), jnp.float32),
        grid=(b,),
        in_specs=[pl.BlockSpec((1, r, HOP), lambda i: (i, 0, 0)),
                  pl.BlockSpec((N_FFT, 2 * F_PAD), lambda i: (0, 0)),
                  pl.BlockSpec((2 * F_PAD, N_FFT), lambda i: (0, 0))],
        out_specs=pl.BlockSpec((1, r, N_FFT), lambda i: (i, 0, 0)),
        compiler_params=pltpu.CompilerParams(
            dimension_semantics=("parallel",),              # megacore over batch
            vmem_limit_bytes=64 * 1024 * 1024),
    )(sig_blocks, jnp.asarray(DFT_FWD_NP), jnp.asarray(DFT_INV_NP))
    # TODO(synk): time-chunked two-pass variant (chunked stats accumulation) for
    # very long audio so the whole-T block also respects v7x's 64 MiB VMEM, and a
    # leading size-2 parallel axis so batch=1 still uses both v7x TensorCores.

    # --- overlap-add via 4 shifted adds (rows >= t are exact zeros; no scatter) ---
    y_blocks = frames_out[:, :, :HOP]
    for j in range(1, N_CHUNKS):
        y_blocks = y_blocks + jnp.roll(
            frames_out[:, :, j * HOP:(j + 1) * HOP], shift=j, axis=1)
    y_ola = y_blocks.reshape(b, r * HOP)

    # --- window-envelope normalization precomputed at trace time + center trim ---
    out_len = HOP * (t - 1)
    env = np.zeros(r * HOP, np.float64)
    w2 = HANN_NP ** 2
    for tt in range(t):
        env[HOP * tt:HOP * tt + N_FFT] += w2
    inv_env = jnp.asarray((1.0 / env[pad:pad + out_len]).astype(np.float32))
    y = y_ola[:, pad:pad + out_len] * inv_env
    return y.astype(x.dtype)
    # TODO(synk): non-stationary mask branch (conv1d moving-average + temperature
    # sigmoid) and the optional xn noise-reference input are not implemented;
    # only the default stationary path of TorchGate.forward is covered.
    # TODO(synk): optional bf16 input slab (keep dB/threshold stats in f32) would
    # halve the remaining HBM traffic on v6e/v7x.


# --------------------------------------- main -----------------------------------
if __name__ == "__main__":
    key = jax.random.PRNGKey(0)
    batch, sig_len = 2, 1024                                # >= 2 * win_length
    x = jax.random.normal(key, (batch, sig_len), dtype=jnp.float32)

    y = jax.jit(torch_gate_forward)(x)
    y = jax.block_until_ready(y)

    assert y.shape == (batch, HOP * (sig_len // HOP)) == (batch, sig_len)
    assert bool(jnp.all(jnp.isfinite(y)))
    print("KERNEL_OK")
</pallas_src>

<mosaic_0001>
module attributes {stable_mosaic.version = 11 : i64} {
  func.func @_torch_gate_kernel(%arg0: i32, %arg1: memref<1x40x32xf32, #tpu.memory_space<vmem>>, %arg2: memref<128x256xf32, #tpu.memory_space<vmem>>, %arg3: memref<256x128xf32, #tpu.memory_space<vmem>>, %arg4: memref<1x40x128xf32, #tpu.memory_space<vmem>>) attributes {dimension_semantics = [#tpu.dimension_semantics<parallel>], iteration_bounds = array<i64: 2>, scalar_prefetch = 0 : i64, scratch_operands = 0 : i64, tpu.core_type = #tpu.core_type<tc>, window_params = [{transform_indices = @transform_0, window_bounds = array<i64: 1, 40, 32>}, {pipeline_mode = #tpu.pipeline_mode<synchronous>, transform_indices = @transform_1, window_bounds = array<i64: 128, 256>}, {pipeline_mode = #tpu.pipeline_mode<synchronous>, transform_indices = @transform_2, window_bounds = array<i64: 256, 128>}, {transform_indices = @transform_3, window_bounds = array<i64: 1, 40, 128>}]} {
    %c0 = arith.constant 0 : index
    %c0_0 = arith.constant 0 : index
    %c0_1 = arith.constant 0 : index
    %0 = vector.load %arg1[%c0, %c0_0, %c0_1] : memref<1x40x32xf32, #tpu.memory_space<vmem>>, vector<1x40x32xf32>
    %1 = vector.shape_cast %0 : vector<1x40x32xf32> to vector<40x32xf32>
    %c0_2 = arith.constant 0 : index
    %c0_3 = arith.constant 0 : index
    %2 = vector.load %arg2[%c0_2, %c0_3] : memref<128x256xf32, #tpu.memory_space<vmem>>, vector<128x256xf32>
    %c0_4 = arith.constant 0 : index
    %c0_5 = arith.constant 0 : index
    %3 = vector.load %arg3[%c0_4, %c0_5] : memref<256x128xf32, #tpu.memory_space<vmem>>, vector<256x128xf32>
    %4 = vector.extract_strided_slice %2 {offsets = [0, 0], sizes = [32, 256], strides = [1, 1]} : vector<128x256xf32> to vector<32x256xf32>
    %cst = arith.constant dense<0.000000e+00> : vector<40x256xf32>
    %5 = tpu.matmul %1, %4, %cst {dimension_numbers = #tpu.dot_dimension_numbers<[1], [0], [0], [1], [0, 0, 1, 1], [], []>} : vector<40x32xf32>, vector<32x256xf32>, vector<40x256xf32> -> vector<40x256xf32>
    %c39_i32 = arith.constant 39 : i32
    %6 = tpu.dynamic_rotate %1 by %c39_i32 dim 0 : vector<40x32xf32>, i32 -> vector<40x32xf32>
    %7 = vector.extract_strided_slice %2 {offsets = [32, 0], sizes = [32, 256], strides = [1, 1]} : vector<128x256xf32> to vector<32x256xf32>
    %cst_6 = arith.constant dense<0.000000e+00> : vector<40x256xf32>
    %8 = tpu.matmul %6, %7, %cst_6 {dimension_numbers = #tpu.dot_dimension_numbers<[1], [0], [0], [1], [0, 0, 1, 1], [], []>} : vector<40x32xf32>, vector<32x256xf32>, vector<40x256xf32> -> vector<40x256xf32>
    %9 = arith.addf %5, %8 : vector<40x256xf32>
    %c38_i32 = arith.constant 38 : i32
    %10 = tpu.dynamic_rotate %1 by %c38_i32 dim 0 : vector<40x32xf32>, i32 -> vector<40x32xf32>
    %11 = vector.extract_strided_slice %2 {offsets = [64, 0], sizes = [32, 256], strides = [1, 1]} : vector<128x256xf32> to vector<32x256xf32>
    %cst_7 = arith.constant dense<0.000000e+00> : vector<40x256xf32>
    %12 = tpu.matmul %10, %11, %cst_7 {dimension_numbers = #tpu.dot_dimension_numbers<[1], [0], [0], [1], [0, 0, 1, 1], [], []>} : vector<40x32xf32>, vector<32x256xf32>, vector<40x256xf32> -> vector<40x256xf32>
    %13 = arith.addf %9, %12 : vector<40x256xf32>
    %c37_i32 = arith.constant 37 : i32
    %14 = tpu.dynamic_rotate %1 by %c37_i32 dim 0 : vector<40x32xf32>, i32 -> vector<40x32xf32>
    %15 = vector.extract_strided_slice %2 {offsets = [96, 0], sizes = [32, 256], strides = [1, 1]} : vector<128x256xf32> to vector<32x256xf32>
    %cst_8 = arith.constant dense<0.000000e+00> : vector<40x256xf32>
    %16 = tpu.matmul %14, %15, %cst_8 {dimension_numbers = #tpu.dot_dimension_numbers<[1], [0], [0], [1], [0, 0, 1, 1], [], []>} : vector<40x32xf32>, vector<32x256xf32>, vector<40x256xf32> -> vector<40x256xf32>
    %17 = arith.addf %13, %16 : vector<40x256xf32>
    %18 = vector.extract_strided_slice %17 {offsets = [0, 0], sizes = [40, 128], strides = [1, 1]} : vector<40x256xf32> to vector<40x128xf32>
    %19 = vector.extract_strided_slice %17 {offsets = [0, 128], sizes = [40, 128], strides = [1, 1]} : vector<40x256xf32> to vector<40x128xf32>
    %20 = tpu.iota {dimensions = array<i32: 0>} : vector<40x128xi32>
    %21 = tpu.iota {dimensions = array<i32: 1>} : vector<40x128xi32>
    %c33_i32 = arith.constant 33 : i32
    %22 = vector.broadcast %c33_i32 : i32 to vector<40x128xi32>
    %23 = arith.cmpi slt, %20, %22 : vector<40x128xi32>
    %c65_i32 = arith.constant 65 : i32
    %24 = vector.broadcast %c65_i32 : i32 to vector<40x128xi32>
    %25 = arith.cmpi slt, %21, %24 : vector<40x128xi32>
    %26 = arith.mulf %18, %18 : vector<40x128xf32>
    %27 = arith.mulf %19, %19 : vector<40x128xf32>
    %28 = arith.addf %26, %27 : vector<40x128xf32>
    %29 = math.sqrt %28 : vector<40x128xf32>
    %cst_9 = arith.constant 2.22044605E-16 : f32
    %30 = vector.broadcast %cst_9 : f32 to vector<40x128xf32>
    %31 = arith.addf %29, %30 : vector<40x128xf32>
    %32 = math.log %31 : vector<40x128xf32>
    %cst_10 = arith.constant 0.434294492 : f32
    %33 = vector.broadcast %cst_10 : f32 to vector<40x128xf32>
    %34 = arith.mulf %32, %33 : vector<40x128xf32>
    %cst_11 = arith.constant 2.000000e+01 : f32
    %35 = vector.broadcast %cst_11 : f32 to vector<40x128xf32>
    %36 = arith.mulf %35, %34 : vector<40x128xf32>
    %cst_12 = arith.constant -1.000000e+30 : f32
    %37 = vector.broadcast %cst_12 : f32 to vector<40x128xf32>
    %38 = arith.select %23, %36, %37 : vector<40x128xi1>, vector<40x128xf32>
    %cst_13 = arith.constant dense<0xFF800000> : vector<128xf32>
    %39 = vector.multi_reduction <maximumf>, %38, %cst_13 [0] : vector<40x128xf32> to vector<128xf32>
    %40 = vector.shape_cast %39 : vector<128xf32> to vector<1x128xf32>
    %cst_14 = arith.constant 4.000000e+01 : f32
    %41 = vector.broadcast %cst_14 : f32 to vector<1x128xf32>
    %42 = arith.subf %40, %41 : vector<1x128xf32>
    %43 = vector.broadcast %42 : vector<1x128xf32> to vector<40x128xf32>
    %44 = arith.maximumf %36, %43 : vector<40x128xf32>
    %cst_15 = arith.constant 0.000000e+00 : f32
    %45 = vector.broadcast %cst_15 : f32 to vector<40x128xf32>
    %46 = arith.select %23, %44, %45 : vector<40x128xi1>, vector<40x128xf32>
    %cst_16 = arith.constant dense<0.000000e+00> : vector<128xf32>
    %47 = vector.multi_reduction <add>, %46, %cst_16 [0] : vector<40x128xf32> to vector<128xf32>
    %48 = vector.shape_cast %47 : vector<128xf32> to vector<1x128xf32>
    %cst_17 = arith.constant 3.300000e+01 : f32
    %49 = vector.broadcast %cst_17 : f32 to vector<1x128xf32>
    %50 = arith.divf %48, %49 : vector<1x128xf32>
    %51 = vector.broadcast %50 : vector<1x128xf32> to vector<40x128xf32>
    %52 = arith.subf %44, %51 : vector<40x128xf32>
    %cst_18 = arith.constant 0.000000e+00 : f32
    %53 = vector.broadcast %cst_18 : f32 to vector<40x128xf32>
    %54 = arith.select %23, %52, %53 : vector<40x128xi1>, vector<40x128xf32>
    %55 = arith.mulf %54, %54 : vector<40x128xf32>
    %cst_19 = arith.constant dense<0.000000e+00> : vector<128xf32>
    %56 = vector.multi_reduction <add>, %55, %cst_19 [0] : vector<40x128xf32> to vector<128xf32>
    %57 = vector.shape_cast %56 : vector<128xf32> to vector<1x128xf32>
    %cst_20 = arith.constant 3.200000e+01 : f32
    %58 = vector.broadcast %cst_20 : f32 to vector<1x128xf32>
    %59 = arith.divf %57, %58 : vector<1x128xf32>
    %60 = math.sqrt %59 : vector<1x128xf32>
    %cst_21 = arith.constant 1.500000e+00 : f32
    %61 = vector.broadcast %cst_21 : f32 to vector<1x128xf32>
    %62 = arith.mulf %60, %61 : vector<1x128xf32>
    %63 = arith.addf %50, %62 : vector<1x128xf32>
    %64 = vector.broadcast %63 : vector<1x128xf32> to vector<40x128xf32>
    %65 = arith.cmpf ogt, %44, %64 : vector<40x128xf32>
    %66 = arith.extui %65 : vector<40x128xi1> to vector<40x128xi32>
    %67 = arith.sitofp %66 : vector<40x128xi32> to vector<40x128xf32>
    %cst_22 = arith.constant 1.000000e+00 : f32
    %68 = vector.broadcast %cst_22 : f32 to vector<40x128xf32>
    %69 = arith.subf %67, %68 : vector<40x128xf32>
    %cst_23 = arith.constant 1.000000e+00 : f32
    %70 = vector.broadcast %cst_23 : f32 to vector<40x128xf32>
    %71 = arith.mulf %70, %69 : vector<40x128xf32>
    %cst_24 = arith.constant 1.000000e+00 : f32
    %72 = vector.broadcast %cst_24 : f32 to vector<40x128xf32>
    %73 = arith.addf %71, %72 : vector<40x128xf32>
    %74 = arith.andi %23, %25 : vector<40x128xi1>
    %cst_25 = arith.constant 0.000000e+00 : f32
    %75 = vector.broadcast %cst_25 : f32 to vector<40x128xf32>
    %76 = arith.select %74, %73, %75 : vector<40x128xi1>, vector<40x128xf32>
    %cst_26 = arith.constant 0.000000e+00 : f32
    %77 = vector.broadcast %cst_26 : f32 to vector<40x128xf32>
    %c2_i32 = arith.constant 2 : i32
    %78 = tpu.dynamic_rotate %76 by %c2_i32 dim 1 : vector<40x128xf32>, i32 -> vector<40x128xf32>
    %cst_27 = arith.constant 0.111111112 : f32
    %79 = vector.broadcast %cst_27 : f32 to vector<40x128xf32>
    %80 = arith.mulf %79, %78 : vector<40x128xf32>
    %81 = arith.addf %77, %80 : vector<40x128xf32>
    %c1_i32 = arith.constant 1 : i32
    %82 = tpu.dynamic_rotate %76 by %c1_i32 dim 1 : vector<40x128xf32>, i32 -> vector<40x128xf32>
    %cst_28 = arith.constant 0.222222224 : f32
    %83 = vector.broadcast %cst_28 : f32 to vector<40x128xf32>
    %84 = arith.mulf %83, %82 : vector<40x128xf32>
    %85 = arith.addf %81, %84 : vector<40x128xf32>
    %cst_29 = arith.constant 0.333333343 : f32
    %86 = vector.broadcast %cst_29 : f32 to vector<40x128xf32>
    %87 = arith.mulf %86, %76 : vector<40x128xf32>
    %88 = arith.addf %85, %87 : vector<40x128xf32>
    %c127_i32 = arith.constant 127 : i32
    %89 = tpu.dynamic_rotate %76 by %c127_i32 dim 1 : vector<40x128xf32>, i32 -> vector<40x128xf32>
    %cst_30 = arith.constant 0.222222224 : f32
    %90 = vector.broadcast %cst_30 : f32 to vector<40x128xf32>
    %91 = arith.mulf %90, %89 : vector<40x128xf32>
    %92 = arith.addf %88, %91 : vector<40x128xf32>
    %c126_i32 = arith.constant 126 : i32
    %93 = tpu.dynamic_rotate %76 by %c126_i32 dim 1 : vector<40x128xf32>, i32 -> vector<40x128xf32>
    %cst_31 = arith.constant 0.111111112 : f32
    %94 = vector.broadcast %cst_31 : f32 to vector<40x128xf32>
    %95 = arith.mulf %94, %93 : vector<40x128xf32>
    %96 = arith.addf %92, %95 : vector<40x128xf32>
    %cst_32 = arith.constant 0.000000e+00 : f32
    %97 = vector.broadcast %cst_32 : f32 to vector<40x128xf32>
    %c3_i32 = arith.constant 3 : i32
    %98 = tpu.dynamic_rotate %96 by %c3_i32 dim 0 : vector<40x128xf32>, i32 -> vector<40x128xf32>
    %cst_33 = arith.constant 6.250000e-02 : f32
    %99 = vector.broadcast %cst_33 : f32 to vector<40x128xf32>
    %100 = arith.mulf %99, %98 : vector<40x128xf32>
    %101 = arith.addf %97, %100 : vector<40x128xf32>
    %c2_i32_34 = arith.constant 2 : i32
    %102 = tpu.dynamic_rotate %96 by %c2_i32_34 dim 0 : vector<40x128xf32>, i32 -> vector<40x128xf32>
    %cst_35 = arith.constant 1.250000e-01 : f32
    %103 = vector.broadcast %cst_35 : f32 to vector<40x128xf32>
    %104 = arith.mulf %103, %102 : vector<40x128xf32>
    %105 = arith.addf %101, %104 : vector<40x128xf32>
    %c1_i32_36 = arith.constant 1 : i32
    %106 = tpu.dynamic_rotate %96 by %c1_i32_36 dim 0 : vector<40x128xf32>, i32 -> vector<40x128xf32>
    %cst_37 = arith.constant 1.875000e-01 : f32
    %107 = vector.broadcast %cst_37 : f32 to vector<40x128xf32>
    %108 = arith.mulf %107, %106 : vector<40x128xf32>
    %109 = arith.addf %105, %108 : vector<40x128xf32>
    %cst_38 = arith.constant 2.500000e-01 : f32
    %110 = vector.broadcast %cst_38 : f32 to vector<40x128xf32>
    %111 = arith.mulf %110, %96 : vector<40x128xf32>
    %112 = arith.addf %109, %111 : vector<40x128xf32>
    %c39_i32_39 = arith.constant 39 : i32
    %113 = tpu.dynamic_rotate %96 by %c39_i32_39 dim 0 : vector<40x128xf32>, i32 -> vector<40x128xf32>
    %cst_40 = arith.constant 1.875000e-01 : f32
    %114 = vector.broadcast %cst_40 : f32 to vector<40x128xf32>
    %115 = arith.mulf %114, %113 : vector<40x128xf32>
    %116 = arith.addf %112, %115 : vector<40x128xf32>
    %c38_i32_41 = arith.constant 38 : i32
    %117 = tpu.dynamic_rotate %96 by %c38_i32_41 dim 0 : vector<40x128xf32>, i32 -> vector<40x128xf32>
    %cst_42 = arith.constant 1.250000e-01 : f32
    %118 = vector.broadcast %cst_42 : f32 to vector<40x128xf32>
    %119 = arith.mulf %118, %117 : vector<40x128xf32>
    %120 = arith.addf %116, %119 : vector<40x128xf32>
    %c37_i32_43 = arith.constant 37 : i32
    %121 = tpu.dynamic_rotate %96 by %c37_i32_43 dim 0 : vector<40x128xf32>, i32 -> vector<40x128xf32>
    %cst_44 = arith.constant 6.250000e-02 : f32
    %122 = vector.broadcast %cst_44 : f32 to vector<40x128xf32>
    %123 = arith.mulf %122, %121 : vector<40x128xf32>
    %124 = arith.addf %120, %123 : vector<40x128xf32>
    %cst_45 = arith.constant 0.000000e+00 : f32
    %125 = vector.broadcast %cst_45 : f32 to vector<40x128xf32>
    %126 = arith.select %23, %124, %125 : vector<40x128xi1>, vector<40x128xf32>
    %127 = arith.mulf %18, %126 : vector<40x128xf32>
    %128 = vector.extract_strided_slice %3 {offsets = [0, 0], sizes = [128, 128], strides = [1, 1]} : vector<256x128xf32> to vector<128x128xf32>
    %cst_46 = arith.constant dense<0.000000e+00> : vector<40x128xf32>
    %129 = tpu.matmul %127, %128, %cst_46 {dimension_numbers = #tpu.dot_dimension_numbers<[1], [0], [0], [1], [0, 0, 1, 1], [], []>} : vector<40x128xf32>, vector<128x128xf32>, vector<40x128xf32> -> vector<40x128xf32>
    %130 = arith.mulf %19, %126 : vector<40x128xf32>
    %131 = vector.extract_strided_slice %3 {offsets = [128, 0], sizes = [128, 128], strides = [1, 1]} : vector<256x128xf32> to vector<128x128xf32>
    %cst_47 = arith.constant dense<0.000000e+00> : vector<40x128xf32>
    %132 = tpu.matmul %130, %131, %cst_47 {dimension_numbers = #tpu.dot_dimension_numbers<[1], [0], [0], [1], [0, 0, 1, 1], [], []>} : vector<40x128xf32>, vector<128x128xf32>, vector<40x128xf32> -> vector<40x128xf32>
    %133 = arith.addf %129, %132 : vector<40x128xf32>
    %134 = vector.shape_cast %133 : vector<40x128xf32> to vector<1x40x128xf32>
    %c0_48 = arith.constant 0 : index
    %c0_49 = arith.constant 0 : index
    %c0_50 = arith.constant 0 : index
    %135 = vector.load %arg4[%c0_48, %c0_49, %c0_50] : memref<1x40x128xf32, #tpu.memory_space<vmem>>, vector<1x40x128xf32>
    tpu.vector_store %arg4[%c0_48, %c0_49, %c0_50], %134 {strides = array<i32>} : memref<1x40x128xf32, #tpu.memory_space<vmem>>, vector<1x40x128xf32>,
    return
  }
  func.func @transform_0(%arg0: i32) -> (i32, i32, i32) {
    %c0_i32 = arith.constant 0 : i32
    %c0_i32_0 = arith.constant 0 : i32
    %c0_i32_1 = arith.constant 0 : i32
    return %arg0, %c0_i32, %c0_i32_0 : i32, i32, i32
  }
  func.func @transform_1(%arg0: i32) -> (i32, i32) {
    %c0_i32 = arith.constant 0 : i32
    %c0_i32_0 = arith.constant 0 : i32
    %c0_i32_1 = arith.constant 0 : i32
    return %c0_i32, %c0_i32_0 : i32, i32
  }
  func.func @transform_2(%arg0: i32) -> (i32, i32) {
    %c0_i32 = arith.constant 0 : i32
    %c0_i32_0 = arith.constant 0 : i32
    %c0_i32_1 = arith.constant 0 : i32
    return %c0_i32, %c0_i32_0 : i32, i32
  }
  func.func @transform_3(%arg0: i32) -> (i32, i32, i32) {
    %c0_i32 = arith.constant 0 : i32
    %c0_i32_0 = arith.constant 0 : i32
    %c0_i32_1 = arith.constant 0 : i32
    return %arg0, %c0_i32, %c0_i32_0 : i32, i32, i32
  }
}

</mosaic_0001>

<bundles_post_ra>
// kernel: torch_gate_forward.1
= control target key start
LH: loop header
LB: loop body
LE: loop exit
PB: predicated region body
PF: predicated region fallthrough
CT: control target
= control target key end

     0   :  { %8 = vsyncpa [#allocation3], 0  ;;  %s2828_s0 = inlined_call_operand.hbm [shape: f32[2,40,32], index: 0, kind: input, shape index: {}]   ;;  %s2829_s1 = inlined_call_operand.hbm [shape: f32[128,256], index: 1, kind: input, shape index: {}]   ;;  %s2830_s2 = inlined_call_operand.hbm [shape: f32[256,128], index: 2, kind: input, shape index: {}]   ;;  %s2831_s3 = inlined_call_operand.hbm [shape: f32[2,40,128], index: 3, kind: output, shape index: {}]  }
   0x1   :  { %10 = vsyncpa [#allocation3 + $0x1], 0 }
   0x2   :  { %11 = vsyncpa [#allocation6], 0 }
   0x3   :  { %12 = vsyncpa [#allocation4], 0 }
   0x4   :  { %14 = vsyncpa [#allocation4 + $0x1], 0  ;;  %s2108_s12 = smov 0   ;;  %s2110_s13 = smov 0  }
   0x5   :  { %s2112_s14 = smov 0   ;;  %s2114_s15 = smov 0  }
   0x6 LB: > { %s2129_s16 = sadd.s32 4294967295, %s2069_s15   ;;  %s1508_s17 = sadd.s32 4294967294, %s2069_s15   ;;  %s2069_s15 = sphi %s2114_s15, %s2851_s15   ;;  %s2065_s14 = sphi %s2112_s14, %s2850_s14   ;;  %s2061_s13 = sphi %s2110_s13, %s2849_s13   ;;  %s2057_s12 = sphi %s2108_s12, %s2848_s12  }
   0x7   : > { %p40_p0 = scmp.ne.s32.totalorder %s2061_s13, %s2057_s12  ;;  %p2832_p1 = scmp.eq.s32.totalorder %s2129_s16, 0 }
   0x8   : > { %p112_p3 = scmp.eq.s32.totalorder %s1508_s17, 1  ;;  %p1509_p5 = scmp.ge.s32.totalorder %s2069_s15, 1 }
   0x9   : > { %p2138_p4 = por %p2832_p1, %p40_p0  ;;  %p119_p7 = scmp.lt.s32.totalorder %s2069_s15, 3 }
   0xa   : > { %p2143_p6 = por %p112_p3, %p40_p0  ;;  %s2071_s21 = smov [#allocation5]  }
   0xb   : > { %s2835_s18 = scalar_select %p2138_p4, 1, 0 }
   0xc   : > { %s2836_s19 = scalar_select %p2143_p6, 1, 0 }
   0xd   : > { %p2148_p8 = pnand %p1509_p5, %p119_p7  ;;  %s131_s22 = sshll.u32 %s2071_s21, 4  ;;  %s2152_s22 = int_to_ptr.vmem [resolvable:$true] %s131_s22 }
   0xe   : > { %s2072_s24 = smov [#allocation7]   ;;  %s1913_s28 = scalar_lea.hbm %s2829_s1, 4096 }
   0xf   : > { %p1823_p9 = pneg %p2148_p8  ;;  %s144_s25 = sshll.u32 %s2072_s24, 4  ;;  %s2163_s25 = int_to_ptr.vmem [resolvable:$true] %s144_s25 }
  0x10   : > { %p1914_p12 = scmp.ne.s32.totalorder %s2829_s1, %s1913_s28  ;;  %p1920_p5 = scmp.lt.u32.totalorder %s1913_s28, %s2829_s1 }
  0x11   : > { %p2159_p11 = pnand %p1823_p9, %p2832_p1 }
  0x13   : > { %p1915_p13 = pneg %p2159_p11 }
  0x15   : > { %p1916_p0 = pnand %p1915_p13, %p1914_p12 }
  0x17   : > { %p1917_p3 = pneg %p1916_p0 }
  0x19   : > { %p1922_p7 = pnand %p1920_p5, %p1917_p3 }
  0x1b   : > { %1925 = shalt.err (!%p1922_p7)
}
  0x1c   : > { %s1926_s6 = scalar_lea.vmem %s2152_s22, 4096  ;;  %p1934_p2 = scmp.lt.s32.totalorder %s2152_s22, %s2152_s22 }
  0x1d   : > { %p1927_p9 = scmp.ne.s32.totalorder %s2152_s22, %s1926_s6  ;;  %p1935_p12 = scmp.lt.s32.totalorder %s1926_s6, %s1926_s6 }
  0x1f   : > { %p1929_p10 = pnand %p1927_p9, %p1915_p13  ;;  %p1936_p0 = por %p1935_p12, %p1934_p2 }
  0x21   : > { %p1930_p1 = pneg %p1929_p10 }
  0x23   : > { %p1937_p6 = pnand %p1936_p0, %p1930_p1 }
  0x25   : > { %1940 = shalt.err (!%p1937_p6)
}
  0x26   : > { %s2073_s7 = smov 256   ;;  %s2074_s8 = smov 16  }
  0x27   : > { %1826 = dma.hbm_to_vmem [thread:$0]  (!%p2159_p11), %s2829_s1, 4096, %s2152_s22, [#allocation6], %s2073_s7, %s2073_s7, %s2074_s8  }
  0x28   : > { %s1941_s21 = scalar_lea.hbm %s2830_s2, 4096 }
  0x29   : > { %p1942_p2 = scmp.ne.s32.totalorder %s2830_s2, %s1941_s21  ;;  %p1948_p10 = scmp.lt.u32.totalorder %s1941_s21, %s2830_s2 }
  0x2b   : > { %p1944_p1 = pnand %p1942_p2, %p1915_p13 }
  0x2d   : > { %p1945_p6 = pneg %p1944_p1 }
  0x2f   : > { %p1950_p3 = pnand %p1948_p10, %p1945_p6 }
  0x31   : > { %1953 = shalt.err (!%p1950_p3)
}
  0x32   : > { %s1954_s22 = scalar_lea.vmem %s2163_s25, 4096  ;;  %p1962_p12 = scmp.lt.s32.totalorder %s2163_s25, %s2163_s25 }
  0x33   : > { %p1955_p5 = scmp.ne.s32.totalorder %s2163_s25, %s1954_s22  ;;  %p1963_p0 = scmp.lt.s32.totalorder %s1954_s22, %s1954_s22 }
  0x35   : > { %p1957_p7 = pnand %p1955_p5, %p1915_p13  ;;  %p1964_p2 = por %p1963_p0, %p1962_p12 }
  0x37   : > { %p1958_p9 = pneg %p1957_p7 }
  0x39   : > { %p1965_p1 = pnand %p1964_p2, %p1958_p9 }
  0x3b   : > { %1968 = shalt.err (!%p1965_p1)
}
  0x3c   : > { %s2075_s29 = smov 128   ;;  %s2076_s30 = smov 8  }
  0x3d   : > { %1829 = dma.hbm_to_vmem [thread:$0]  (!%p2159_p11), %s2830_s2, 4096, %s2163_s25, [#allocation6], %s2075_s29, %s2075_s29, %s2076_s30  }
  0x3e   : > { %s2221_s6 = sadd.s32 1, %s2069_s15   ;;  %s27_s8 = sadd.s32 1, %s2065_s14 }
  0x3f   : > { %s24_s7 = ssub.s32 %s2069_s15, %s2221_s6  ;;  %p34_p6 = scmp.ne.s32.totalorder %s2065_s14, %s2061_s13 }
  0x40   : > { %p25_p13 = scmp.eq.s32.totalorder %s24_s7, 0  ;;  %p35_p10 = scmp.eq.s32.totalorder %s2069_s15, 0 }
  0x41   : > { %p2839_p5 = scmp.eq.s32.totalorder %s2129_s16, 1  ;;  %p1840_p9 = scmp.lt.s32.totalorder %s2069_s15, 2 }
  0x42   : > { %s2230_s9 = scalar_select %p25_p13, %s2065_s14, %s27_s8  }
  0x43   : > { %p36_p3 = por %p35_p10, %p34_p6  ;;  %p2234_p7 = por %p2839_p5, %p34_p6 }
  0x44   : > { %s158_s10 = sand.u32 1, %s2065_s14   ;;  %s1808_s25 = smul.u32 640, %s2069_s15 }
  0x45   : > { %s2840_s23 = scalar_select %p2234_p7, 1, 0 }
  0x46   : > { %s1807_s11 = smul.u32 40, %s158_s10  ;;  %p2241_p11 = pnand %p1840_p9, %p36_p3 }
  0x47   : > { %s2248_s26 = scalar_lea.hbm %s2828_s0, %s1808_s25  ;;  %s2252_s22 = scalar_lea.sflag [#allocation3], %s158_s10 }
  0x48   : > { %s162_s27 = scalar_lea.vmem [#allocation2], %s1807_s11  ;;  %s1969_s4 = scalar_lea.hbm %s2248_s26, 640 }
  0x49   : > { %s169_s28 = sshll.u32 %s162_s27, 4  ;;  %p1970_p12 = scmp.ne.s32.totalorder %s2248_s26, %s1969_s4  ;;  %s2250_s28 = int_to_ptr.vmem [resolvable:$true] %s169_s28 }
  0x4a   : > { %p1971_p0 = pneg %p2241_p11  ;;  %s1974_s8 = scalar_lea.hbm %s2828_s0, 1280 }
  0x4b   : > { %p1975_p13 = scmp.lt.u32.totalorder %s2248_s26, %s2828_s0  ;;  %p1976_p6 = scmp.lt.u32.totalorder %s1974_s8, %s1969_s4 }
  0x4c   : > { %p1972_p2 = pnand %p1971_p0, %p1970_p12  ;;  %p1978_p3 = scmp.lt.u32.totalorder %s1969_s4, %s2248_s26 }
  0x4d   : > { %p1977_p10 = por %p1976_p6, %p1975_p13 }
  0x4e   : > { %p1973_p1 = pneg %p1972_p2 }
  0x4f   : > { %p1979_p5 = por %p1978_p3, %p1977_p10 }
  0x51   : > { %p1980_p9 = pnand %p1979_p5, %p1973_p1 }
  0x53   : > { %1983 = shalt.err (!%p1980_p9)
}
  0x54   : > { %s1984_s10 = scalar_lea.vmem %s2250_s28, 640  ;;  %s2077_s11 = smov [#allocation2]  }
  0x55   : > { %p1985_p12 = scmp.ne.s32.totalorder %s2250_s28, %s1984_s10  ;;  %s1989_s24 = sshll.u32 %s2077_s11, 4  ;;  %s1990_s24 = int_to_ptr.vmem [resolvable:$false] %s1989_s24 }
  0x56   : > { %s1991_s27 = scalar_lea.vmem %s1990_s24, 1280  ;;  %p1992_p4 = scmp.lt.s32.totalorder %s2250_s28, %s1990_s24 }
  0x57   : > { %p1987_p2 = pnand %p1985_p12, %p1971_p0  ;;  %p1993_p13 = scmp.lt.s32.totalorder %s1991_s27, %s1984_s10 }
  0x59   : > { %p1988_p7 = pneg %p1987_p2  ;;  %p1994_p6 = por %p1993_p13, %p1992_p4 }
  0x5b   : > { %p1995_p10 = pnand %p1994_p6, %p1988_p7 }
  0x5d   : > { %1998 = shalt.err (!%p1995_p10)
}
  0x5e   : > { %1833 = dma.hbm_to_vmem [thread:$0]  (!%p2241_p11), %s2248_s26, 640, %s2250_s28, %s2252_s22, %s2075_s29, %s2075_s29, %s2076_s30  }
  0x5f   : > { %181 = sbr.rel (%p2148_p8) target bundleno = 974 (0x3ce), region = 32  ;;  %s2286_s4 = sand.u32 (!%p2148_p8), 1, %s2061_s13  }
  0x60   : > { %s1809_s5 = smul.u32 (!%p2148_p8), 40, %s2286_s4  ;;  %s184_s7 = scalar_lea.sflag (!%p2148_p8), [#allocation3], %s2286_s4 }
  0x61   : > { %p2842_p4 = scmp.ne.s32.totalorder (!%p2148_p8), %s2835_s18, 0 }
  0x62   : > { %s2292_s17 = scalar_lea.vmem (!%p2148_p8), [#allocation2], %s1809_s5 }
  0x66   : > { %2044 = dma.done.wait (%p2842_p4), %s184_s7, 640  }
  0x67   : > { %2046 = vsyncadd (%p2842_p4), %s184_s7, 4294966656  ;;  %p2843_p7 = scmp.eq.s32.totalorder %s2129_s16, 0 }
  0x69   : > { %2048 = dma.done.wait (%p2843_p7), [#allocation6], 8192   ;;  %p2844_p8 = pmov %p2843_p7 }
  0x6a   : > { %v2078_v0 = vmov 0.0   ;;  %v292_v1 = vlaneseq  ;;  %v232_v2 = vld [vmem:[#allocation5 + $0x48] sm:$0xff]  ;;  %v234_v3 = vld [vmem:[#allocation5 + $0x58] sm:$0xff]  ;;  %v231_v4 = vld [vmem:[#allocation5 + $0x40] sm:$0xff]  ;;  %vm300_vm1 = vcmask 261120   ;;  %s2080_s18 = smov 1  }
  0x6b   : > { %2050 = vsyncadd (%p2844_p8), [#allocation6], 4294959104  ;;  %380 = vmatprep.mubr.f32.mxu0 %v2078_v0  ;;  %v1687_v5 = vpack.c.bf16 %v234_v3, %v232_v2  ;;  %v233_v6 = vld [vmem:[#allocation5 + $0x50] sm:$0xff]  ;;  %v236_v7 = vld [vmem:[#allocation5 + $0x68] sm:$0xff]  ;;  %s2081_s20 = smov 2   ;;  %s2082_s29 = smov 127  }
  0x6c   : > { %v238_v8 = vld [vmem:[#allocation5 + $0x78] sm:$0xff]  ;;  %v2304_v9 = vshrl.u32 %v292_v1, 7  ;;  %v1689_v10 = vpack.c.bf16 %v233_v6, %v231_v4  ;;  %v235_v12 = vld [vmem:[#allocation5 + $0x60] sm:$0xff]  ;;  %v237_v13 = vld [vmem:[#allocation5 + $0x70] sm:$0xff]  ;;  %s2083_s30 = smov 126   ;;  %s217_s26 = scalar_lea.vmem [#allocation8], %s1809_s5 }
  0x6d   : > { %v1691_v11 = vpack.c.bf16 %v238_v8, %v236_v7  ;;  %v2307_v14 = vld [vmem:[%s2292_s17] sm:$0xff]  ;;  %1688 = vmatprep.subr.bf16.mxu0 %v1687_v5  ;;  %v2310_v15 = vld [vmem:[%s2292_s17 + $0x8] sm:$0xff]  ;;  %v224_v16 = vld [vmem:[#allocation5 + $0x8] sm:$0xff]  ;;  %v1693_v18 = vpack.c.bf16 %v237_v13, %v235_v12  ;;  %s1416_s28 = sshll.u32 %s217_s26, 4  ;;  %s1810_s22 = smul.u32 640, %s2129_s16  ;;  %s2779_s28 = int_to_ptr.vmem [resolvable:$true] %s1416_s28 }
  0x6e   : > { %v226_v17 = vld [vmem:[#allocation5 + $0x18] sm:$0xff]  ;;  %1690 = vmatpush1.bf16.msra.mxu0 %v1689_v10  ;;  %v287_v19 = vrot.slane %v2307_v14, 1  ;;  %v288_v20 = vrot.slane %v2310_v15, 1  ;;  %vm294_vm0 = vcmp.lt.s32.totalorder %v2304_v9, 7  ;;  %v223_v22 = vld [vmem:[#allocation5] sm:$0xff]  ;;  %v225_v23 = vld [vmem:[#allocation5 + $0x10] sm:$0xff] }
  0x6f   : > { %1692 = vmatprep.subr.bf16.mxu0 %v1691_v11  ;;  %v1695_v21 = vpack.c.bf16 %v226_v17, %v224_v16  ;;  %v2316_v24 = vld [vmem:[%s2292_s17 + $0x10] sm:$0xff]  ;;  %v230_v26 = vld [vmem:[#allocation5 + $0x38] sm:$0xff]  ;;  %v1697_v28 = vpack.c.bf16 %v225_v23, %v223_v22  ;;  %v2322_v30 = vld [vmem:[%s2292_s17 + $0x18] sm:$0xff]  ;;  %v521_v57 = vrot.slane %v2307_v14, 2  ;;  %v522_v58 = vrot.slane %v2310_v15, 2  ;;  %s2784_s21 = scalar_lea.hbm %s2831_s3, %s1810_s22  ;;  %s1403_s10 = scalar_lea.sflag [#allocation4], %s2286_s4 }
  0x70   : > { %v228_v25 = vld [vmem:[#allocation5 + $0x28] sm:$0xff]  ;;  %v298_v27 = vsel %vm294_vm0, %v287_v19, %v288_v20  ;;  %v289_v29 = vrot.slane %v2316_v24, 1  ;;  %v227_v32 = vld [vmem:[#allocation5 + $0x20] sm:$0xff]  ;;  %v229_v33 = vld [vmem:[#allocation5 + $0x30] sm:$0xff]  ;;  %v290_v37 = vrot.slane %v2322_v30, 1  ;;  %vm526_vm2 = vcmp.lt.s32.totalorder %v2304_v9, 6 }
  0x71   : > { %v1699_v31 = vpack.c.bf16 %v230_v26, %v228_v25  ;;  %v240_v34 = vld [vmem:[#allocation5 + $0x88] sm:$0xff]  ;;  %v242_v35 = vld [vmem:[#allocation5 + $0x98] sm:$0xff]  ;;  %v1701_v38 = vpack.c.bf16 %v229_v33, %v227_v32  ;;  %v239_v45 = vld [vmem:[#allocation5 + $0x80] sm:$0xff]  ;;  %v530_v63 = vsel %vm526_vm2, %v521_v57, %v522_v58  ;;  %v523_v3 = vrot.slane %v2316_v24, 2  ;;  %s1999_s11 = scalar_lea.vmem %s2779_s28, 640  ;;  %p2845_p0 = scmp.ne.s32.totalorder %s2840_s23, 0 }
  0x72   : > { %1694 = vmatpush1.bf16.msra.mxu0 %v1693_v18  ;;  %v297_v36 = vsel %vm294_vm0, %v288_v20, %v289_v29  ;;  %v2330_v39 = vld [vmem:[%s2292_s17 + $0x20] sm:$0xff]  ;;  %v1703_v40 = vpack.c.bf16 %v242_v35, %v240_v34  ;;  %v296_v41 = vsel %vm294_vm0, %v289_v29, %v290_v37  ;;  %v244_v47 = vld [vmem:[#allocation5 + $0xa8] sm:$0xff]  ;;  %v243_v51 = vld [vmem:[#allocation5 + $0xa0] sm:$0xff]  ;;  %v524_v8 = vrot.slane %v2322_v30, 2  ;;  %p2000_p11 = scmp.ne.s32.totalorder %s2779_s28, %s1999_s11  ;;  %s2085_s16 = smov [#allocation8]  }
  0x73   : > { %1696 = vmatprep.subr.bf16.mxu0 %v1695_v21  ;;  %v291_v42 = vrot.slane %v2330_v39, 1  ;;  %v241_v46 = vld [vmem:[#allocation5 + $0x90] sm:$0xff]  ;;  %v246_v48 = vld [vmem:[#allocation5 + $0xb8] sm:$0xff]  ;;  %v248_v53 = vld [vmem:[#allocation5 + $0xc8] sm:$0xff]  ;;  %v529_v7 = vsel %vm526_vm2, %v522_v58, %v523_v3  ;;  %v525_v12 = vrot.slane %v2330_v39, 2  ;;  %v652_v17 = vrot.slane %v2307_v14, 3 }
  0x74   : > { %v1705_v49 = vpack.c.bf16 %v241_v46, %v239_v45  ;;  %v1707_v50 = vpack.c.bf16 %v246_v48, %v244_v47  ;;  %v245_v52 = vld [vmem:[#allocation5 + $0xb0] sm:$0xff]  ;;  %v250_v54 = vld [vmem:[#allocation5 + $0xd8] sm:$0xff]  ;;  %v247_v59 = vld [vmem:[#allocation5 + $0xc0] sm:$0xff]  ;;  %v528_v11 = vsel %vm526_vm2, %v523_v3, %v524_v8  ;;  %v653_v18 = vrot.slane %v2310_v15, 3  ;;  %p2001_p1 = pnand %p2000_p11, %p2845_p0  ;;  %s2003_s24 = sshll.u32 %s2085_s16, 4  ;;  %s2004_s24 = int_to_ptr.vmem [resolvable:$false] %s2003_s24 }
  0x75   : > { %1517 = vmatmul.mubr.msk.f32.vlgmr.msra.gmra.mrb[0].mxu0 %vm300_vm1, %v298_v27  ;;  %v295_v43 = vsel %vm294_vm0, %v290_v37, %v291_v42  ;;  %v299_v44 = vsel %vm294_vm0, %v291_v42, %v287_v19  ;;  %v1709_v55 = vpack.c.bf16 %v245_v52, %v243_v51  ;;  %v1711_v56 = vpack.c.bf16 %v250_v54, %v248_v53  ;;  %v249_v60 = vld [vmem:[#allocation5 + $0xd0] sm:$0xff]  ;;  %v252_v61 = vld [vmem:[#allocation5 + $0xe8] sm:$0xff]  ;;  %v254_v62 = vld [vmem:[#allocation5 + $0xf8] sm:$0xff]  ;;  %s2005_s27 = scalar_lea.vmem %s2004_s24, 1280  ;;  %p2006_p5 = scmp.lt.s32.totalorder %s2779_s28, %s2004_s24 }
  0x76   : > { %1698 = vmatpush1.bf16.msra.mxu0 %v1697_v28  ;;  %386 = vmatprep.mubr.f32.mxu0 %v2078_v0  ;;  %v1713_v2 = vpack.c.bf16 %v249_v60, %v247_v59  ;;  %v1715_v4 = vpack.c.bf16 %v254_v62, %v252_v61  ;;  %v251_v5 = vld [vmem:[#allocation5 + $0xe0] sm:$0xff]  ;;  %v253_v6 = vld [vmem:[#allocation5 + $0xf0] sm:$0xff]  ;;  %v527_v13 = vsel %vm526_vm2, %v524_v8, %v525_v12  ;;  %vm657_vm3 = vcmp.lt.s32.totalorder %v2304_v9, 5  ;;  %p2002_p3 = pneg %p2001_p1  ;;  %p2007_p9 = scmp.lt.s32.totalorder %s2005_s27, %s1999_s11 }
  0x77   : > { %1700 = vmatprep.subr.bf16.mxu0 %v1699_v31  ;;  %v1717_v10 = vpack.c.bf16 %v253_v6, %v251_v5  ;;  %v531_v16 = vsel %vm526_vm2, %v525_v12, %v521_v57  ;;  %v661_v19 = vsel %vm657_vm3, %v652_v17, %v653_v18  ;;  %v654_v20 = vrot.slane %v2316_v24, 3 }
  0x78   : > { %v656_v22 = vrot.slane %v2330_v39, 3  ;;  %p2008_p12 = por %p2007_p9, %p2006_p5 }
  0x79   : > { %1518 = vmatmul.mubr.msk.f32.gmra.mrb[2].mxu0 %vm300_vm1, %v297_v36 }
  0x7a   : > { %392 = vmatprep.mubr.f32.mxu0 %v2078_v0  ;;  %1702 = vmatpush1.bf16.msra.mxu0 %v1701_v38  ;;  %p2009_p2 = pnand %p2008_p12, %p2002_p3 }
  0x7b   : > { %1704 = vmatprep.subr.bf16.mxu0 %v1703_v40 }
  0x7d   : > { %1519 = vmatmul.mubr.msk.f32.gmra.mrb[4].mxu0 %vm300_vm1, %v296_v41 }
  0x7e   : > { %398 = vmatprep.mubr.f32.mxu0 %v2078_v0 }
  0x81   : > { %1520 = vmatmul.mubr.msk.f32.gmra.mrb[6].mxu0 %vm300_vm1, %v295_v43 }
  0x82   : > { %404 = vmatprep.mubr.f32.mxu0 %v2078_v0 }
  0x85   : > { %1521 = vmatmul.mubr.msk.f32.gmra.mrb[8].mxu0 %vm300_vm1, %v299_v44 }
  0x86   : > { %490 = vmatprep.mubr.f32.mxu0 %v2078_v0 }
  0x89   : > { %1522 = vmatmul.mubr.msk.f32.vlgmr.msra.gmra.mrb[0].mxu0 %vm300_vm1, %v2307_v14  ;;  %v660_v14 = vsel %vm657_vm3, %v653_v18, %v654_v20 }
  0x8a   : > { %1706 = vmatpush1.bf16.msra.mxu0 %v1705_v49  ;;  %496 = vmatprep.mubr.f32.mxu0 %v2078_v0 }
  0x8b   : > { %1708 = vmatprep.subr.bf16.mxu0 %v1707_v50 }
  0x8d   : > { %1523 = vmatmul.mubr.msk.f32.gmra.mrb[2].mxu0 %vm300_vm1, %v2310_v15  ;;  %v655_v15 = vrot.slane %v2322_v30, 3 }
  0x8e   : > { %502 = vmatprep.mubr.f32.mxu0 %v2078_v0  ;;  %1710 = vmatpush1.bf16.msra.mxu0 %v1709_v55 }
  0x8f   : > { %1712 = vmatprep.subr.bf16.mxu0 %v1711_v56  ;;  %v659_v21 = vsel %vm657_vm3, %v654_v20, %v655_v15  ;;  %v658_v23 = vsel %vm657_vm3, %v655_v15, %v656_v22 }
  0x91   : > { %1524 = vmatmul.mubr.msk.f32.gmra.mrb[4].mxu0 %vm300_vm1, %v2316_v24  ;;  %v662_v24 = vsel %vm657_vm3, %v656_v22, %v652_v17 }
  0x92   : > { %508 = vmatprep.mubr.f32.mxu0 %v2078_v0 }
  0x95   : > { %1525 = vmatmul.mubr.msk.f32.gmra.mrb[6].mxu0 %vm300_vm1, %v2322_v30 }
  0x96   : > { %514 = vmatprep.mubr.f32.mxu0 %v2078_v0 }
  0x99   : > { %1526 = vmatmul.mubr.msk.f32.gmra.mrb[8].mxu0 %vm300_vm1, %v2330_v39 }
  0x9a   : > { %611 = vmatprep.mubr.f32.mxu0 %v2078_v0 }
  0x9d   : > { %1527 = vmatmul.mubr.msk.f32.vlgmr.msra.gmra.mrb[0].mxu0 %vm300_vm1, %v530_v63 }
  0x9e   : > { %1714 = vmatpush1.bf16.msra.mxu0 %v1713_v2  ;;  %617 = vmatprep.mubr.f32.mxu0 %v2078_v0 }
  0x9f   : > { %1716 = vmatprep.subr.bf16.mxu0 %v1715_v4 }
  0xa1   : > { %1528 = vmatmul.mubr.msk.f32.gmra.mrb[2].mxu0 %vm300_vm1, %v529_v7 }
  0xa2   : > { %623 = vmatprep.mubr.f32.mxu0 %v2078_v0  ;;  %1718 = vmatpush1.bf16.msra.mxu0 %v1717_v10 }
  0xa5   : > { %1529 = vmatmul.mubr.msk.f32.gmra.mrb[4].mxu0 %vm300_vm1, %v528_v11 }
  0xa6   : > { %629 = vmatprep.mubr.f32.mxu0 %v2078_v0 }
  0xa9   : > { %1530 = vmatmul.mubr.msk.f32.gmra.mrb[6].mxu0 %vm300_vm1, %v527_v13 }
  0xaa   : > { %635 = vmatprep.mubr.f32.mxu0 %v2078_v0 }
  0xad   : > { %1531 = vmatmul.mubr.msk.f32.gmra.mrb[8].mxu0 %vm300_vm1, %v531_v16 }
  0xae   : > { %742 = vmatprep.mubr.f32.mxu0 %v2078_v0 }
  0xb1   : > { %1532 = vmatmul.mubr.msk.f32.vlgmr.msra.gmra.mrb[0].mxu0 %vm300_vm1, %v661_v19 }
  0xb2   : > { %748 = vmatprep.mubr.f32.mxu0 %v2078_v0 }
  0xb5   : > { %1533 = vmatmul.mubr.msk.f32.gmra.mrb[2].mxu0 %vm300_vm1, %v660_v14 }
  0xb6   : > { %754 = vmatprep.mubr.f32.mxu0 %v2078_v0 }
  0xb9   : > { %1534 = vmatmul.mubr.msk.f32.gmra.mrb[4].mxu0 %vm300_vm1, %v659_v21 }
  0xba   : > { %760 = vmatprep.mubr.f32.mxu0 %v2078_v0 }
  0xbd   : > { %1535 = vmatmul.mubr.msk.f32.gmra.mrb[6].mxu0 %vm300_vm1, %v658_v23 }
  0xbe   : > { %766 = vmatprep.mubr.f32.mxu0 %v2078_v0 }
  0xc1   : > { %1536 = vmatmul.mubr.msk.f32.gmra.mrb[8].mxu0 %vm300_vm1, %v662_v24 }
 0x184   : > { %v2413_v25 = vpop.f32.mrb[0].mxu0 }
 0x185   : > { %v795_v26 = vmul.f32 %v2413_v25, %v2413_v25  ;;  %v2417_v27 = vpop.f32.mrb[1].mxu0 }
 0x186   : > { %v800_v28 = vmul.f32 %v2417_v27, %v2417_v27 }
 0x188   : > { %v805_v29 = vadd.f32 %v800_v28, %v795_v26  ;;  %v2421_v30 = vpop.f32.mrb[2].mxu0 }
 0x189   : > { %v796_v31 = vmul.f32 %v2421_v30, %v2421_v30  ;;  %v2425_v32 = vpop.f32.mrb[3].mxu0 }
 0x18a   : > { %1891 = vrsqrt.f32 %v805_v29  ;;  %v801_v33 = vmul.f32 %v2425_v32, %v2425_v32  ;;  %vm812_vm4 = vcmp.eq.f32.partialorder %v805_v29, inf  ;;  %v815_v56 = vand.u32 2147483648, %v805_v29 }
 0x18b   : > { %vm814_vm6 = vcmp.eq.f32.partialorder %v805_v29, 0.0 }
 0x18c   : > { %v2429_v34 = vpop.f32.mrb[4].mxu0  ;;  %v806_v35 = vadd.f32 %v801_v33, %v796_v31  ;;  %v2454_v31 = vadd.s32 32, %v2304_v9 }
 0x18d   : > { %v797_v36 = vmul.f32 %v2429_v34, %v2429_v34  ;;  %v2433_v37 = vpop.f32.mrb[5].mxu0 }
 0x18e   : > { %v802_v38 = vmul.f32 %v2433_v37, %v2433_v37  ;;  %1893 = vrsqrt.f32 %v806_v35  ;;  %vm819_vm5 = vcmp.eq.f32.partialorder %v806_v35, inf  ;;  %v822_v59 = vand.u32 2147483648, %v806_v35 }
 0x18f   : > { %vm821_vm8 = vcmp.eq.f32.partialorder %v806_v35, 0.0  ;;  %vm793_vm14 = vcmp.lt.s32.totalorder %v2454_v31, 33 }
 0x190   : > { %v807_v39 = vadd.f32 %v802_v38, %v797_v36  ;;  %v2437_v40 = vpop.f32.mrb[6].mxu0 }
 0x191   : > { %v798_v41 = vmul.f32 %v2437_v40, %v2437_v40  ;;  %v2441_v42 = vpop.f32.mrb[7].mxu0 }
 0x192   : > { %1895 = vrsqrt.f32 %v807_v39  ;;  %v803_v43 = vmul.f32 %v2441_v42, %v2441_v42  ;;  %vm826_vm7 = vcmp.eq.f32.partialorder %v807_v39, inf  ;;  %v829_v60 = vand.u32 2147483648, %v807_v39 }
 0x193   : > { %vm828_vm9 = vcmp.eq.f32.partialorder %v807_v39, 0.0 }
 0x194   : > { %v2445_v44 = vpop.f32.mrb[8].mxu0  ;;  %v1892_v45 = vpop.eup %1891  ;;  %v808_v46 = vadd.f32 %v803_v43, %v798_v41 }
 0x195   : > { %v799_v47 = vmul.f32 %v2445_v44, %v2445_v44  ;;  %v2449_v48 = vpop.f32.mrb[9].mxu0  ;;  %v811_v50 = vmul.f32 %v1892_v45, %v805_v29 }
 0x196   : > { %v804_v49 = vmul.f32 %v2449_v48, %v2449_v48  ;;  %1897 = vrsqrt.f32 %v808_v46  ;;  %vm833_vm10 = vcmp.eq.f32.partialorder %v808_v46, inf  ;;  %v836_v8 = vand.u32 2147483648, %v808_v46 }
 0x197   : > { %v813_v55 = vsel %vm812_vm4, %v805_v29, %v811_v50  ;;  %vm835_vm11 = vcmp.eq.f32.partialorder %v808_v46, 0.0 }
 0x198   : > { %v809_v51 = vadd.f32 %v804_v49, %v799_v47  ;;  %v1894_v52 = vpop.eup %1893  ;;  %v816_v62 = vsel %vm814_vm6, %v815_v56, %v813_v55 }
 0x199   : > { %v818_v53 = vmul.f32 %v1894_v52, %v806_v35  ;;  %v845_v6 = vadd.f32 2.220446e-16, %v816_v62 }
 0x19a   : > { %1899 = vrsqrt.f32 %v809_v51  ;;  %vm840_vm12 = vcmp.eq.f32.partialorder %v809_v51, inf  ;;  %v843_v17 = vand.u32 2147483648, %v809_v51  ;;  %vm842_vm13 = vcmp.eq.f32.partialorder %v809_v51, 0.0 }
 0x19b   : > { %v820_v57 = vsel %vm819_vm5, %v806_v35, %v818_v53 }
 0x19c   : > { %v1896_v54 = vpop.eup %1895  ;;  %v823_v63 = vsel %vm821_vm8, %v822_v59, %v820_v57 }
 0x19d   : > { %v825_v58 = vmul.f32 %v1896_v54, %v807_v39  ;;  %v846_v7 = vadd.f32 2.220446e-16, %v823_v63 }
 0x19f   : > { %v827_v61 = vsel %vm826_vm7, %v807_v39, %v825_v58 }
 0x1a0   : > { %v830_v2 = vsel %vm828_vm9, %v829_v60, %v827_v61  ;;  %v1898_v3 = vpop.eup %1897 }
 0x1a1   : > { %v847_v4 = vadd.f32 2.220446e-16, %v830_v2  ;;  %v832_v5 = vmul.f32 %v1898_v3, %v808_v46 }
 0x1a3   : > { %1901 = vlog2.f32 %v847_v4  ;;  %v834_v11 = vsel %vm833_vm10, %v808_v46, %v832_v5 }
 0x1a4   : > { %v1900_v10 = vpop.eup %1899  ;;  %v837_v12 = vsel %vm835_vm11, %v836_v8, %v834_v11  ;;  %1903 = vlog2.f32 %v845_v6  ;;  %vm2084_vm11 = vmmov 0  }
 0x1a5   : > { %v839_v13 = vmul.f32 %v1900_v10, %v809_v51  ;;  %v848_v16 = vadd.f32 2.220446e-16, %v837_v12  ;;  %1905 = vlog2.f32 %v846_v7  ;;  %1625 = vmatprep.mubr.msk.f32.mxu1 %vm2084_vm11, %v2078_v0 }
 0x1a7   : > { %v841_v18 = vsel %vm840_vm12, %v809_v51, %v839_v13  ;;  %1907 = vlog2.f32 %v848_v16  ;;  %vm1074_vm12 = vcmp.lt.s32.totalorder %v2304_v9, 3 }
 0x1a8   : > { %v844_v19 = vsel %vm842_vm13, %v843_v17, %v841_v18  ;;  %vm1095_vm13 = vcmp.lt.s32.totalorder %v2304_v9, 2 }
 0x1a9   : > { %v849_v20 = vadd.f32 2.220446e-16, %v844_v19 }
 0x1ab   : > { %1909 = vlog2.f32 %v849_v20 }
 0x1ad   : > { %v1902_v14 = vpop.eup %1901 }
 0x1ae   : > { %v855_v15 = vmul.f32 0.6931472, %v1902_v14  ;;  %v1904_v21 = vpop.eup %1903 }
 0x1af   : > { %v1906_v22 = vpop.eup %1905  ;;  %v851_v24 = vmul.f32 0.6931472, %v1904_v21 }
 0x1b0   : > { %v862_v28 = vmul.f32 0.4342945, %v855_v15  ;;  %v853_v33 = vmul.f32 0.6931472, %v1906_v22 }
 0x1b1   : > { %v1908_v23 = vpop.eup %1907  ;;  %v860_v38 = vmul.f32 0.4342945, %v851_v24 }
 0x1b2   : > { %v857_v26 = vmul.f32 0.6931472, %v1908_v23  ;;  %v867_v39 = vmul.f32 20.0, %v862_v28  ;;  %v861_v45 = vmul.f32 0.4342945, %v853_v33 }
 0x1b3   : > { %v865_v49 = vmul.f32 20.0, %v860_v38 }
 0x1b4   : > { %v863_v35 = vmul.f32 0.4342945, %v857_v26  ;;  %v866_v51 = vmul.f32 20.0, %v861_v45 }
 0x1b5   : > { %v1910_v29 = vpop.eup %1909 }
 0x1b6   : > { %v859_v36 = vmul.f32 0.6931472, %v1910_v29  ;;  %v868_v41 = vmul.f32 20.0, %v863_v35 }
 0x1b8   : > { %v864_v43 = vmul.f32 0.4342945, %v859_v36  ;;  %v877_v46 = vmax.f32 %v867_v39, %v868_v41 }
 0x1ba   : > { %v869_v47 = vmul.f32 20.0, %v864_v43 }
 0x1bc   : > { %v874_v50 = vsel %vm793_vm14, %v869_v47, -1e+30 }
 0x1bd   : > { %v875_v52 = vmax.f32 %v865_v49, %v874_v50 }
 0x1bf   : > { %v876_v53 = vmax.f32 %v875_v52, %v866_v51 }
 0x1c1   : > { %v878_v54 = vmax.f32 %v876_v53, %v877_v46 }
 0x1c3   : > { %v879_v55 = vrot.slane %v878_v54, 4 }
 0x1c5   : > { %v880_v56 = vmax.f32 %v878_v54, %v879_v55 }
 0x1c7   : > { %v881_v57 = vrot.slane %v880_v56, 2 }
 0x1c9   : > { %v882_v58 = vmax.f32 %v880_v56, %v881_v57 }
 0x1cb   : > { %v883_v59 = vrot.slane %v882_v58, 1 }
 0x1cd   : > { %v884_v60 = vmax.f32 %v882_v58, %v883_v59  ;;  %v2478_v58 = vand.u32 127, %v292_v1  ;;  %v271_v59 = vld [vmem:[#allocation7 + $0x80] sm:$0xff]  ;;  %v2079_v1 = vmov 0.0|0.0  }
 0x1ce   : > { %1719 = vmatprep.subr.bf16.mxu1 %v2079_v1 }
 0x1cf   : > { %v1537_v61 = vadd.f32 -40.0, %v884_v60  ;;  %v272_v60 = vld [vmem:[#allocation7 + $0x88] sm:$0xff]  ;;  %vm794_vm6 = vcmp.lt.s32.totalorder %v2478_v58, 65 }
 0x1d0   : > { %vm973_vm8 = vmand %vm793_vm14, %vm794_vm6 }
 0x1d1   : > { %v886_v62 = vmax.f32 %v865_v49, %v1537_v61  ;;  %v2459_v63 = vmax.f32 %v866_v51, %v1537_v61  ;;  %v2461_v2 = vmax.f32 %v867_v39, %v1537_v61  ;;  %v2463_v3 = vmax.f32 %v868_v41, %v1537_v61 }
 0x1d2   : > { %v890_v4 = vmax.f32 %v869_v47, %v1537_v61 }
 0x1d3   : > { %v896_v5 = vadd.f32 %v2459_v63, %v886_v62 }
 0x1d4   : > { %v895_v8 = vsel %vm793_vm14, %v890_v4, 0.0 }
 0x1d5   : > { %v897_v6 = vadd.f32 %v896_v5, %v2461_v2 }
 0x1d7   : > { %v898_v7 = vadd.f32 %v897_v6, %v2463_v3 }
 0x1d9   : > { %v899_v10 = vadd.f32 %v898_v7, %v895_v8  ;;  %v1720_v8 = vpack.c.bf16 %v272_v60, %v271_v59 }
 0x1db   : > { %v900_v11 = vrot.slane %v899_v10, 4  ;;  %1721 = vmatpush3.bf16.msra.mxu1 %v1720_v8 }
 0x1dc   : > { %1722 = vmatprep.subr.bf16.mxu1 %v2079_v1 }
 0x1dd   : > { %v901_v12 = vadd.f32 %v900_v11, %v899_v10 }
 0x1df   : > { %v902_v13 = vrot.slane %v901_v12, 2 }
 0x1e1   : > { %v903_v16 = vadd.f32 %v902_v13, %v901_v12 }
 0x1e3   : > { %v904_v17 = vrot.slane %v903_v16, 1 }
 0x1e5   : > { %v905_v18 = vadd.f32 %v904_v17, %v903_v16  ;;  %v275_v17 = vld [vmem:[#allocation7 + $0xa0] sm:$0xff] }
 0x1e7   : > { %v907_v19 = vmul.f32 0.030303031, %v905_v18  ;;  %v276_v18 = vld [vmem:[#allocation7 + $0xa8] sm:$0xff] }
 0x1e9   : > { %v908_v20 = vsub.f32 %v886_v62, %v907_v19  ;;  %v909_v14 = vsub.f32 %v2459_v63, %v907_v19  ;;  %v910_v15 = vsub.f32 %v2461_v2, %v907_v19  ;;  %v912_v21 = vsub.f32 %v890_v4, %v907_v19 }
 0x1ea   : > { %v911_v22 = vsub.f32 %v2463_v3, %v907_v19 }
 0x1eb   : > { %v918_v23 = vmul.f32 %v908_v20, %v908_v20  ;;  %v919_v24 = vmul.f32 %v909_v14, %v909_v14  ;;  %v920_v26 = vmul.f32 %v910_v15, %v910_v15  ;;  %v917_v29 = vsel %vm793_vm14, %v912_v21, 0.0  ;;  %v277_v15 = vld [vmem:[#allocation7 + $0xb0] sm:$0xff]  ;;  %v278_v21 = vld [vmem:[#allocation7 + $0xb8] sm:$0xff] }
 0x1ec   : > { %v921_v33 = vmul.f32 %v911_v22, %v911_v22  ;;  %v922_v36 = vmul.f32 %v917_v29, %v917_v29 }
 0x1ed   : > { %v923_v28 = vadd.f32 %v919_v24, %v918_v23  ;;  %v279_v24 = vld [vmem:[#allocation7 + $0xc0] sm:$0xff] }
 0x1ef   : > { %v924_v35 = vadd.f32 %v923_v28, %v920_v26  ;;  %v280_v26 = vld [vmem:[#allocation7 + $0xc8] sm:$0xff] }
 0x1f0   : > { %v1732_v29 = vpack.c.bf16 %v280_v26, %v279_v24 }
 0x1f1   : > { %v925_v38 = vadd.f32 %v924_v35, %v921_v33  ;;  %v282_v33 = vld [vmem:[#allocation7 + $0xd8] sm:$0xff] }
 0x1f3   : > { %v926_v39 = vadd.f32 %v925_v38, %v922_v36 }
 0x1f5   : > { %v927_v41 = vrot.slane %v926_v39, 4 }
 0x1f7   : > { %v928_v43 = vadd.f32 %v927_v41, %v926_v39  ;;  %v283_v39 = vld [vmem:[#allocation7 + $0xe0] sm:$0xff]  ;;  %v284_v41 = vld [vmem:[#allocation7 + $0xe8] sm:$0xff] }
 0x1f9   : > { %v929_v45 = vrot.slane %v928_v43, 2 }
 0x1fb   : > { %v930_v46 = vadd.f32 %v929_v45, %v928_v43 }
 0x1fd   : > { %v931_v47 = vrot.slane %v930_v46, 1 }
 0x1ff   : > { %v932_v49 = vadd.f32 %v931_v47, %v930_v46 }
 0x201   : > { %v934_v50 = vmul.f32 0.03125, %v932_v49  ;;  %v285_v49 = vld [vmem:[#allocation7 + $0xf0] sm:$0xff] }
 0x203   : > { %1911 = vrsqrt.f32 %v934_v50  ;;  %vm937_vm15 = vcmp.eq.f32.partialorder %v934_v50, inf  ;;  %v940_v53 = vand.u32 2147483648, %v934_v50  ;;  %vm939_vm1 = vcmp.eq.f32.partialorder %v934_v50, 0.0 }
 0x20d   : > { %v1912_v51 = vpop.eup %1911 }
 0x20e   : > { %v936_v52 = vmul.f32 %v1912_v51, %v934_v50 }
 0x210   : > { %v938_v54 = vsel %vm937_vm15, %v934_v50, %v936_v52  ;;  %v286_v50 = vld [vmem:[#allocation7 + $0xf8] sm:$0xff]  ;;  %vm1116_vm15 = vcmp.lt.s32.totalorder %v2304_v9, 1 }
 0x211   : > { %v941_v55 = vsel %vm939_vm1, %v940_v53, %v938_v54  ;;  %v1741_v51 = vpack.c.bf16 %v286_v50, %v285_v49 }
 0x212   : > { %v942_v56 = vmul.f32 1.5, %v941_v55 }
 0x214   : > { %v2475_v57 = vadd.f32 %v942_v56, %v907_v19  ;;  %v1726_v19 = vpack.c.bf16 %v276_v18, %v275_v17 }
 0x216   : > { %vm944_vm4 = vcmp.gt.f32.partialorder %v886_v62, %v2475_v57  ;;  %vm948_vm5 = vcmp.gt.f32.partialorder %v890_v4, %v2475_v57  ;;  %vm945_vm7 = vcmp.gt.f32.partialorder %v2459_v63, %v2475_v57  ;;  %v273_v62 = vld [vmem:[#allocation7 + $0x90] sm:$0xff]  ;;  %v274_v4 = vld [vmem:[#allocation7 + $0x98] sm:$0xff]  ;;  %v1729_v63 = vpack.c.bf16 %v278_v21, %v277_v15 }
 0x217   : > { %v1538_v61 = vsel %vm944_vm4, 1.0, %v2078_v0  ;;  %v1542_v5 = vsel %vm948_vm5, 1.0, %v2078_v0  ;;  %v1723_v11 = vpack.c.bf16 %v274_v4, %v273_v62  ;;  %v1539_v16 = vsel %vm945_vm7, 1.0, %v2078_v0 }
 0x218   : > { %v1543_v6 = vadd.f32 -1.0, %v1538_v61  ;;  %v1547_v7 = vadd.f32 -1.0, %v1542_v5  ;;  %v1544_v14 = vadd.f32 -1.0, %v1539_v16  ;;  %vm946_vm9 = vcmp.gt.f32.partialorder %v2461_v2, %v2475_v57  ;;  %v281_v2 = vld [vmem:[#allocation7 + $0xd0] sm:$0xff] }
 0x219   : > { %1724 = vmatpush3.bf16.msra.mxu1 %v1723_v11  ;;  %v1540_v28 = vsel %vm946_vm9, 1.0, %v2078_v0  ;;  %vm947_vm10 = vcmp.gt.f32.partialorder %v2463_v3, %v2475_v57  ;;  %v1735_v35 = vpack.c.bf16 %v282_v33, %v281_v2  ;;  %v1738_v3 = vpack.c.bf16 %v284_v41, %v283_v39 }
 0x21a   : > { %v964_v10 = vadd.f32 1.0, %v1543_v6  ;;  %v968_v13 = vadd.f32 1.0, %v1547_v7  ;;  %1725 = vmatprep.subr.bf16.mxu1 %v2079_v1  ;;  %v965_v22 = vadd.f32 1.0, %v1544_v14  ;;  %v1545_v36 = vadd.f32 -1.0, %v1540_v28 }
 0x21b   : > { %v1541_v38 = vsel %vm947_vm10, 1.0, %v2078_v0 }
 0x21c   : > { %v2490_v12 = vsel %vm794_vm6, %v964_v10, 0.0  ;;  %v2505_v20 = vsel %vm973_vm8, %v968_v13, 0.0  ;;  %v2521_v23 = vsel %vm794_vm6, %v965_v22, 0.0  ;;  %v966_v43 = vadd.f32 1.0, %v1545_v36 }
 0x21d   : > { %999 = vrot.lane.b32.xlu1 %v2490_v12, %s2080_s18  ;;  %979 = vrot.lane.b32.xlu0 %v2490_v12, %s2081_s20  ;;  %v1546_v45 = vadd.f32 -1.0, %v1541_v38  ;;  %v1023_v7 = vmul.f32 0.33333334, %v2505_v20  ;;  %v1019_v4 = vmul.f32 0.33333334, %v2490_v12 }
 0x21e   : > { %1727 = vmatpush3.bf16.msra.mxu1 %v1726_v19  ;;  %v2544_v46 = vsel %vm794_vm6, %v966_v43, 0.0 }
 0x21f   : > { %1728 = vmatprep.subr.bf16.mxu1 %v2079_v1  ;;  %v967_v47 = vadd.f32 1.0, %v1546_v45 }
 0x221   : > { %1007 = vrot.lane.b32.xlu1 %v2505_v20, %s2080_s18  ;;  %987 = vrot.lane.b32.xlu0 %v2505_v20, %s2081_s20  ;;  %v977_v52 = vsel %vm794_vm6, %v967_v47, 0.0  ;;  %v1021_v47 = vmul.f32 0.33333334, %v2544_v46 }
 0x222   : > { %1730 = vmatpush3.bf16.msra.mxu1 %v1729_v63 }
 0x223   : > { %1731 = vmatprep.subr.bf16.mxu1 %v2079_v1 }
 0x225   : > { %1037 = vrot.lane.b32.xlu1 %v2505_v20, %s2082_s29  ;;  %1029 = vrot.lane.b32.xlu0 %v2490_v12, %s2082_s29 }
 0x226   : > { %1733 = vmatpush3.bf16.msra.mxu1 %v1732_v29  ;;  %v1020_v29 = vmul.f32 0.33333334, %v2521_v23 }
 0x227   : > { %1734 = vmatprep.subr.bf16.mxu1 %v2079_v1 }
 0x229   : > { %1001 = vrot.lane.b32.xlu1 %v2521_v23, %s2080_s18  ;;  %981 = vrot.lane.b32.xlu0 %v2521_v23, %s2081_s20 }
 0x22a   : > { %1736 = vmatpush3.bf16.msra.mxu1 %v1735_v35 }
 0x22b   : > { %1737 = vmatprep.subr.bf16.mxu1 %v2079_v1 }
 0x22d   : > { %1057 = vrot.lane.b32.xlu1 %v2505_v20, %s2083_s30  ;;  %1049 = vrot.lane.b32.xlu0 %v2490_v12, %s2083_s30 }
 0x22e   : > { %1739 = vmatpush3.bf16.msra.mxu1 %v1738_v3 }
 0x22f   : > { %1740 = vmatprep.subr.bf16.mxu1 %v2079_v1 }
 0x231   : > { %1051 = vrot.lane.b32.xlu1 %v2521_v23, %s2083_s30  ;;  %1031 = vrot.lane.b32.xlu0 %v2521_v23, %s2082_s29 }
 0x232   : > { %1742 = vmatpush3.bf16.msra.mxu1 %v1741_v51 }
 0x233   : > { %1743 = vmatprep.subr.bf16.mxu1 %v2079_v1 }
 0x235   : > { %1003 = vrot.lane.b32.xlu1 %v2544_v46, %s2080_s18  ;;  %983 = vrot.lane.b32.xlu0 %v2544_v46, %s2081_s20 }
 0x239   : > { %1005 = vrot.lane.b32.xlu1 %v977_v52, %s2080_s18  ;;  %985 = vrot.lane.b32.xlu0 %v977_v52, %s2081_s20 }
 0x23d   : > { %1053 = vrot.lane.b32.xlu1 %v2544_v46, %s2083_s30  ;;  %1033 = vrot.lane.b32.xlu0 %v2544_v46, %s2082_s29 }
 0x241   : > { %1055 = vrot.lane.b32.xlu1 %v977_v52, %s2083_s30  ;;  %1035 = vrot.lane.b32.xlu0 %v977_v52, %s2082_s29 }
 0x28f   : > { %v1000_v53 = vpop.permute.xlu1 %999  ;;  %v980_v54 = vpop.permute.xlu0 %979 }
 0x290   : > { %v1009_v59 = vmul.f32 0.22222222, %v1000_v53  ;;  %v989_v60 = vmul.f32 0.11111111, %v980_v54  ;;  %v2585_v53 = vmul.f32 0.33333334, %v977_v52 }
 0x292   : > { %v1014_v8 = vadd.f32 %v1009_v59, %v989_v60 }
 0x293   : > { %v1008_v55 = vpop.permute.xlu1 %1007  ;;  %v988_v56 = vpop.permute.xlu0 %987 }
 0x294   : > { %v1013_v57 = vmul.f32 0.22222222, %v1008_v55  ;;  %v993_v58 = vmul.f32 0.11111111, %v988_v56  ;;  %v1024_v19 = vadd.f32 %v1019_v4, %v1014_v8 }
 0x296   : > { %v1018_v61 = vadd.f32 %v1013_v57, %v993_v58 }
 0x297   : > { %v1038_v5 = vpop.permute.xlu1 %1037  ;;  %v1030_v6 = vpop.permute.xlu0 %1029 }
 0x298   : > { %v1028_v10 = vadd.f32 %v1023_v7, %v1018_v61  ;;  %v1043_v62 = vmul.f32 0.22222222, %v1038_v5  ;;  %v1039_v16 = vmul.f32 0.22222222, %v1030_v6 }
 0x29a   : > { %v1048_v14 = vadd.f32 %v1043_v62, %v1028_v10  ;;  %v1044_v63 = vadd.f32 %v1039_v16, %v1024_v19 }
 0x29b   : > { %v1002_v11 = vpop.permute.xlu1 %1001  ;;  %v982_v13 = vpop.permute.xlu0 %981 }
 0x29c   : > { %v1010_v17 = vmul.f32 0.22222222, %v1002_v11  ;;  %v990_v18 = vmul.f32 0.11111111, %v982_v13 }
 0x29e   : > { %v1015_v22 = vadd.f32 %v1010_v17, %v990_v18 }
 0x29f   : > { %v1058_v15 = vpop.permute.xlu1 %1057  ;;  %v1050_v21 = vpop.permute.xlu0 %1049 }
 0x2a0   : > { %v1063_v24 = vmul.f32 0.11111111, %v1058_v15  ;;  %v1059_v26 = vmul.f32 0.11111111, %v1050_v21  ;;  %v1025_v33 = vadd.f32 %v1020_v29, %v1015_v22  ;;  %v255_v29 = vld [vmem:[#allocation7] sm:$0xff] }
 0x2a2   : > { %v2566_v28 = vadd.f32 %v1063_v24, %v1048_v14  ;;  %v2568_v20 = vadd.f32 %v1059_v26, %v1044_v63 }
 0x2a3   : > { %v1052_v12 = vpop.permute.xlu1 %1051  ;;  %v1032_v2 = vpop.permute.xlu0 %1031 }
 0x2a4   : > { %v1040_v35 = vmul.f32 0.22222222, %v1032_v2  ;;  %v1069_v36 = vrot.slane %v2568_v20, 5  ;;  %v1073_v38 = vrot.slane %v2566_v28, 5  ;;  %v1090_v39 = vrot.slane %v2568_v20, 6 }
 0x2a5   : > { %v1094_v41 = vrot.slane %v2566_v28, 6  ;;  %v1111_v23 = vrot.slane %v2568_v20, 7  ;;  %v1115_v3 = vrot.slane %v2566_v28, 7  ;;  %v1060_v43 = vmul.f32 0.11111111, %v1052_v12  ;;  %v256_v12 = vld [vmem:[#allocation7 + $0x8] sm:$0xff] }
 0x2a6   : > { %v1045_v45 = vadd.f32 %v1040_v35, %v1025_v33  ;;  %v1079_v49 = vsel %vm1074_vm12, %v1073_v38, %v1069_v36  ;;  %v1142_v52 = vrot.slane %v2568_v20, 1  ;;  %v1162_v61 = vrot.slane %v2568_v20, 2 }
 0x2a7   : > { %v1004_v50 = vpop.permute.xlu1 %1003  ;;  %v984_v51 = vpop.permute.xlu0 %983  ;;  %v1080_v54 = vmul.f32 0.0625, %v1079_v49  ;;  %v1100_v55 = vsel %vm1095_vm13, %v1094_v41, %v1090_v39  ;;  %v1121_v46 = vsel %vm1116_vm15, %v1115_v3, %v1111_v23  ;;  %v1182_v5 = vrot.slane %v2568_v20, 3 }
 0x2a8   : > { %v2595_v56 = vadd.f32 %v1060_v43, %v1045_v45  ;;  %v1011_v57 = vmul.f32 0.22222222, %v1004_v50  ;;  %v991_v58 = vmul.f32 0.11111111, %v984_v51  ;;  %v1101_v59 = vmul.f32 0.125, %v1100_v55 }
 0x2a9   : > { %v1122_v60 = vmul.f32 0.1875, %v1121_v46  ;;  %v1132_v15 = vmul.f32 0.25, %v2568_v20  ;;  %v1146_v2 = vrot.slane %v2566_v28, 1  ;;  %v1166_v33 = vrot.slane %v2566_v28, 2 }
 0x2aa   : > { %v1016_v6 = vadd.f32 %v1011_v57, %v991_v58  ;;  %v1106_v7 = vadd.f32 %v1101_v59, %v1080_v54  ;;  %v1143_v8 = vrot.slane %v2595_v56, 1  ;;  %v1163_v10 = vrot.slane %v2595_v56, 2 }
 0x2ab   : > { %v1006_v62 = vpop.permute.xlu1 %1005  ;;  %v986_v4 = vpop.permute.xlu0 %985  ;;  %v1183_v11 = vrot.slane %v2595_v56, 3  ;;  %v1070_v13 = vrot.slane %v2595_v56, 5  ;;  %v1091_v16 = vrot.slane %v2595_v56, 6  ;;  %v1112_v17 = vrot.slane %v2595_v56, 7 }
 0x2ac   : > { %v1012_v18 = vmul.f32 0.22222222, %v1006_v62  ;;  %v992_v19 = vmul.f32 0.11111111, %v986_v4  ;;  %v1127_v14 = vadd.f32 %v1122_v60, %v1106_v7  ;;  %v1150_v21 = vsel %vm294_vm0, %v1142_v52, %v1143_v8  ;;  %v257_v62 = vld [vmem:[#allocation7 + $0x10] sm:$0xff]  ;;  %v258_v4 = vld [vmem:[#allocation7 + $0x18] sm:$0xff] }
 0x2ad   : > { %v1170_v63 = vsel %vm526_vm2, %v1162_v61, %v1163_v10  ;;  %v1190_v22 = vsel %vm657_vm3, %v1182_v5, %v1183_v11  ;;  %v1078_v24 = vsel %vm1074_vm12, %v1069_v36, %v1070_v13  ;;  %v1152_v20 = vmul.f32 0.1875, %v1150_v21 }
 0x2ae   : > { %v1137_v26 = vadd.f32 %v1132_v15, %v1127_v14  ;;  %v1026_v43 = vadd.f32 %v1021_v47, %v1016_v6  ;;  %v1081_v49 = vmul.f32 0.0625, %v1078_v24  ;;  %v1099_v50 = vsel %vm1095_vm13, %v1090_v39, %v1091_v16 }
 0x2af   : > { %v1054_v35 = vpop.permute.xlu1 %1053  ;;  %v1034_v45 = vpop.permute.xlu0 %1033  ;;  %v1120_v36 = vsel %vm1116_vm15, %v1111_v23, %v1112_v17  ;;  %v1017_v51 = vadd.f32 %v1012_v18, %v992_v19  ;;  %v1172_v46 = vmul.f32 0.125, %v1170_v63  ;;  %v1192_v57 = vmul.f32 0.0625, %v1190_v22 }
 0x2b0   : > { %v1041_v54 = vmul.f32 0.22222222, %v1034_v45  ;;  %v1157_v55 = vadd.f32 %v1152_v20, %v1137_v26  ;;  %v1744_v58 = vpack.c.bf16 %v256_v12, %v255_v29  ;;  %v1102_v59 = vmul.f32 0.125, %v1099_v50  ;;  %v259_v45 = vld [vmem:[#allocation7 + $0x20] sm:$0xff] }
 0x2b1   : > { %v1186_v47 = vrot.slane %v2566_v28, 3  ;;  %v1061_v60 = vmul.f32 0.11111111, %v1054_v35  ;;  %v2638_v39 = vsel %vm294_vm0, %v1146_v2, %v1142_v52  ;;  %v1123_v14 = vmul.f32 0.1875, %v1120_v36 }
 0x2b2   : > { %v1046_v6 = vadd.f32 %v1041_v54, %v1026_v43  ;;  %v1177_v7 = vadd.f32 %v1172_v46, %v1157_v55  ;;  %v1107_v19 = vadd.f32 %v1102_v59, %v1081_v49  ;;  %v2644_v15 = vsel %vm526_vm2, %v1166_v33, %v1162_v61  ;;  %v260_v49 = vld [vmem:[#allocation7 + $0x28] sm:$0xff] }
 0x2b3   : > { %v1056_v23 = vpop.permute.xlu1 %1055  ;;  %v1036_v18 = vpop.permute.xlu0 %1035  ;;  %v2650_v21 = vsel %vm657_vm3, %v1186_v47, %v1182_v5  ;;  %v1027_v52 = vadd.f32 %v2585_v53, %v1017_v51  ;;  %v1747_v20 = vpack.c.bf16 %v258_v4, %v257_v62  ;;  %v1133_v12 = vmul.f32 0.25, %v2595_v56 }
 0x2b4   : > { %v2652_v63 = vadd.f32 %v1061_v60, %v1046_v6  ;;  %v1042_v22 = vmul.f32 0.22222222, %v1036_v18  ;;  %v1197_v24 = vadd.f32 %v1192_v57, %v1177_v7  ;;  %v1062_v26 = vmul.f32 0.11111111, %v1056_v23  ;;  %v261_v23 = vld [vmem:[#allocation7 + $0x30] sm:$0xff] }
 0x2b5   : > { %v1128_v29 = vadd.f32 %v1123_v14, %v1107_v19 }
 0x2b6   : > { %v1047_v35 = vadd.f32 %v1042_v22, %v1027_v52  ;;  %v2657_v61 = vmul.f32 %v1197_v24, %v2413_v25  ;;  %v1212_v43 = vmul.f32 %v1197_v24, %v2417_v27  ;;  %v1144_v5 = vrot.slane %v2652_v63, 1 }
 0x2b7   : > { %v1138_v50 = vadd.f32 %v1133_v12, %v1128_v29  ;;  %v1164_v53 = vrot.slane %v2652_v63, 2  ;;  %v1184_v36 = vrot.slane %v2652_v63, 3  ;;  %v1071_v51 = vrot.slane %v2652_v63, 5 }
 0x2b8   : > { %v2664_v54 = vadd.f32 %v1062_v26, %v1047_v35  ;;  %1626 = vmatmul.mubr.f32.vlgmr.msra.gmra.mrb[0].mxu1 %v1212_v43  ;;  %v1149_v25 = vsel %vm294_vm0, %v1143_v8, %v1144_v5  ;;  %v1092_v27 = vrot.slane %v2652_v63, 6  ;;  %v1113_v55 = vrot.slane %v2652_v63, 7  ;;  %v263_v43 = vld [vmem:[#allocation7 + $0x40] sm:$0xff] }
 0x2b9   : > { %1745 = vmatpush3.bf16.msra.mxu1 %v1744_v58  ;;  %1628 = vmatprep.mubr.msk.f32.mxu1 %vm2084_vm11, %v2078_v0  ;;  %v1153_v46 = vmul.f32 0.1875, %v1149_v25  ;;  %v1169_v57 = vsel %vm526_vm2, %v1163_v10, %v1164_v53  ;;  %v1189_v59 = vsel %vm657_vm3, %v1183_v11, %v1184_v36  ;;  %v1077_v8 = vsel %vm1074_vm12, %v1070_v13, %v1071_v51  ;;  %v262_v13 = vld [vmem:[#allocation7 + $0x38] sm:$0xff] }
 0x2ba   : > { %1746 = vmatprep.subr.bf16.mxu1 %v2079_v1  ;;  %v1750_v58 = vpack.c.bf16 %v260_v49, %v259_v45  ;;  %v1173_v60 = vmul.f32 0.125, %v1169_v57  ;;  %v1082_v6 = vmul.f32 0.0625, %v1077_v8  ;;  %v1098_v10 = vsel %vm1095_vm13, %v1091_v16, %v1092_v27  ;;  %v264_v45 = vld [vmem:[#allocation7 + $0x48] sm:$0xff] }
 0x2bb   : > { %v1158_v7 = vadd.f32 %v1153_v46, %v1138_v50  ;;  %v1193_v62 = vmul.f32 0.0625, %v1189_v59  ;;  %v1103_v4 = vmul.f32 0.125, %v1098_v10  ;;  %v1119_v11 = vsel %vm1116_vm15, %v1112_v17, %v1113_v55 }
 0x2bc   : > { %v1124_v18 = vmul.f32 0.1875, %v1119_v11  ;;  %v1145_v19 = vrot.slane %v2664_v54, 1  ;;  %v1165_v14 = vrot.slane %v2664_v54, 2  ;;  %v1185_v52 = vrot.slane %v2664_v54, 3  ;;  %v266_v11 = vld [vmem:[#allocation7 + $0x58] sm:$0xff] }
 0x2bd   : > { %1748 = vmatpush3.bf16.msra.mxu1 %v1747_v20  ;;  %v1178_v22 = vadd.f32 %v1173_v60, %v1158_v7  ;;  %v1108_v16 = vadd.f32 %v1103_v4, %v1082_v6  ;;  %v1072_v24 = vrot.slane %v2664_v54, 5  ;;  %v1093_v26 = vrot.slane %v2664_v54, 6  ;;  %v265_v4 = vld [vmem:[#allocation7 + $0x50] sm:$0xff] }
 0x2be   : > { %1749 = vmatprep.subr.bf16.mxu1 %v2079_v1  ;;  %v1148_v56 = vsel %vm294_vm0, %v1144_v5, %v1145_v19  ;;  %v1168_v17 = vsel %vm526_vm2, %v1164_v53, %v1165_v14  ;;  %v1188_v29 = vsel %vm657_vm3, %v1184_v36, %v1185_v52  ;;  %v1114_v12 = vrot.slane %v2664_v54, 7 }
 0x2bf   : > { %v1198_v20 = vadd.f32 %v1193_v62, %v1178_v22  ;;  %v1753_v35 = vpack.c.bf16 %v262_v13, %v261_v23  ;;  %v1129_v49 = vadd.f32 %v1124_v18, %v1108_v16  ;;  %v1134_v50 = vmul.f32 0.25, %v2652_v63 }
 0x2c0   : > { %v1154_v25 = vmul.f32 0.1875, %v1148_v56  ;;  %v1076_v46 = vsel %vm1074_vm12, %v1071_v51, %v1072_v24  ;;  %v1097_v5 = vsel %vm1095_vm13, %v1092_v27, %v1093_v26  ;;  %v1118_v53 = vsel %vm1116_vm15, %v1113_v55, %v1114_v12 }
 0x2c1   : > { %1751 = vmatpush3.bf16.msra.mxu1 %v1750_v58  ;;  %v1213_v36 = vmul.f32 %v1198_v20, %v2425_v32  ;;  %v1139_v57 = vadd.f32 %v1134_v50, %v1129_v49  ;;  %v1083_v59 = vmul.f32 0.0625, %v1076_v46  ;;  %v1104_v8 = vmul.f32 0.125, %v1097_v5  ;;  %v269_v49 = vld [vmem:[#allocation7 + $0x70] sm:$0xff]  ;;  %v270_v50 = vld [vmem:[#allocation7 + $0x78] sm:$0xff] }
 0x2c2   : > { %1752 = vmatprep.subr.bf16.mxu1 %v2079_v1  ;;  %v1756_v60 = vpack.c.bf16 %v264_v45, %v263_v43  ;;  %v1174_v63 = vmul.f32 0.125, %v1168_v17  ;;  %v1147_v51 = vsel %vm294_vm0, %v1145_v19, %v1146_v2  ;;  %v1167_v27 = vsel %vm526_vm2, %v1165_v14, %v1166_v33 }
 0x2c3   : > { %1629 = vmatmul.mubr.f32.gmra.mrb[2].mxu1 %v1213_v36  ;;  %v1159_v55 = vadd.f32 %v1154_v25, %v1139_v57  ;;  %v1194_v32 = vmul.f32 0.0625, %v1188_v29  ;;  %v1109_v58 = vadd.f32 %v1104_v8, %v1083_v59  ;;  %v1125_v6 = vmul.f32 0.1875, %v1118_v53  ;;  %v267_v29 = vld [vmem:[#allocation7 + $0x60] sm:$0xff] }
 0x2c4   : > { %1631 = vmatprep.mubr.msk.f32.mxu1 %vm2084_vm11, %v2078_v0  ;;  %v1187_v10 = vsel %vm657_vm3, %v1185_v52, %v1186_v47  ;;  %v1075_v2 = vsel %vm1074_vm12, %v1072_v24, %v1073_v38  ;;  %v1096_v33 = vsel %vm1095_vm13, %v1093_v26, %v1094_v41  ;;  %v1117_v7 = vsel %vm1116_vm15, %v1114_v12, %v1115_v3  ;;  %v268_v12 = vld [vmem:[#allocation7 + $0x68] sm:$0xff] }
 0x2c5   : > { %1754 = vmatpush3.bf16.msra.mxu1 %v1753_v35  ;;  %v1179_v62 = vadd.f32 %v1174_v63, %v1159_v55  ;;  %v1130_v47 = vadd.f32 %v1125_v6, %v1109_v58  ;;  %v1135_v23 = vmul.f32 0.25, %v2664_v54  ;;  %v1084_v13 = vmul.f32 0.0625, %v1075_v2 }
 0x2c6   : > { %1755 = vmatprep.subr.bf16.mxu1 %v2079_v1  ;;  %v1105_v38 = vmul.f32 0.125, %v1096_v33  ;;  %v1208_v18 = vmul.f32 %v1198_v20, %v2421_v30  ;;  %v1155_v14 = vmul.f32 0.1875, %v1147_v51  ;;  %v1759_v52 = vpack.c.bf16 %v266_v11, %v265_v4 }
 0x2c7   : > { %v1199_v19 = vadd.f32 %v1194_v32, %v1179_v62  ;;  %v1140_v41 = vadd.f32 %v1135_v23, %v1130_v47  ;;  %v1126_v9 = vmul.f32 0.1875, %v1117_v7  ;;  %v1175_v24 = vmul.f32 0.125, %v1167_v27 }
 0x2c8   : > { %v1110_v22 = vadd.f32 %v1105_v38, %v1084_v13  ;;  %v1136_v56 = vmul.f32 0.25, %v2566_v28  ;;  %v1195_v17 = vmul.f32 0.0625, %v1187_v10  ;;  %v1176_v45 = vmul.f32 0.125, %v2644_v15 }
 0x2c9   : > { %1757 = vmatpush3.bf16.msra.mxu1 %v1756_v60  ;;  %v1214_v3 = vmul.f32 %v1199_v19, %v2433_v37  ;;  %v1160_v16 = vadd.f32 %v1155_v14, %v1140_v41  ;;  %v1209_v26 = vmul.f32 %v1199_v19, %v2429_v34  ;;  %v1156_v37 = vmul.f32 0.1875, %v2638_v39 }
 0x2ca   : > { %1758 = vmatprep.subr.bf16.mxu1 %v2079_v1  ;;  %v1131_v54 = vadd.f32 %v1126_v9, %v1110_v22  ;;  %v1762_v34 = vpack.c.bf16 %v268_v12, %v267_v29  ;;  %v1196_v5 = vmul.f32 0.0625, %v2650_v21  ;;  %v1765_v53 = vpack.c.bf16 %v270_v50, %v269_v49 }
 0x2cb   : > { %1632 = vmatmul.mubr.f32.gmra.mrb[4].mxu1 %v1214_v3  ;;  %v1180_v30 = vadd.f32 %v1175_v24, %v1160_v16 }
 0x2cc   : > { %1634 = vmatprep.mubr.msk.f32.mxu1 %vm2084_vm11, %v2078_v0  ;;  %v1141_v20 = vadd.f32 %v1136_v56, %v1131_v54 }
 0x2cd   : > { %1760 = vmatpush3.bf16.msra.mxu1 %v1759_v52  ;;  %v1200_v35 = vadd.f32 %v1195_v17, %v1180_v30 }
 0x2ce   : > { %1761 = vmatprep.subr.bf16.mxu1 %v2079_v1  ;;  %v1161_v43 = vadd.f32 %v1156_v37, %v1141_v20 }
 0x2cf   : > { %v1215_v28 = vmul.f32 %v1200_v35, %v2441_v42  ;;  %v1210_v25 = vmul.f32 %v1200_v35, %v2437_v40 }
 0x2d0   : > { %v1181_v46 = vadd.f32 %v1176_v45, %v1161_v43 }
 0x2d1   : > { %1635 = vmatmul.mubr.f32.gmra.mrb[6].mxu1 %v1215_v28 }
 0x2d2   : > { %1763 = vmatpush3.bf16.msra.mxu1 %v1762_v34  ;;  %1637 = vmatprep.mubr.msk.f32.mxu1 %vm2084_vm11, %v2078_v0  ;;  %v1201_v39 = vadd.f32 %v1196_v5, %v1181_v46 }
 0x2d3   : > { %1764 = vmatprep.subr.bf16.mxu1 %v2079_v1 }
 0x2d4   : > { %v1206_v15 = vsel %vm793_vm14, %v1201_v39, 0.0 }
 0x2d5   : > { %v1216_v42 = vmul.f32 %v1206_v15, %v2449_v48  ;;  %v1211_v40 = vmul.f32 %v1206_v15, %v2445_v44 }
 0x2d6   : > { %1766 = vmatpush3.bf16.msra.mxu1 %v1765_v53 }
 0x2d7   : > { %1638 = vmatmul.mubr.f32.gmra.mrb[8].mxu1 %v1216_v42 }
 0x2d8   : > { %1672 = vmatprep.mubr.msk.f32.mxu1 %vm2084_vm11, %v2078_v0 }
 0x2db   : > { %1673 = vmatmul.mubr.f32.vlgmr.msra.gmra.mrb[0].mxu1 %v2657_v61 }
 0x2dc   : > { %1675 = vmatprep.mubr.msk.f32.mxu1 %vm2084_vm11, %v2078_v0 }
 0x2df   : > { %1676 = vmatmul.mubr.f32.gmra.mrb[2].mxu1 %v1208_v18 }
 0x2e0   : > { %1678 = vmatprep.mubr.msk.f32.mxu1 %vm2084_vm11, %v2078_v0 }
 0x2e3   : > { %1679 = vmatmul.mubr.f32.gmra.mrb[4].mxu1 %v1209_v26 }
 0x2e4   : > { %1681 = vmatprep.mubr.msk.f32.mxu1 %vm2084_vm11, %v2078_v0 }
 0x2e7   : > { %1682 = vmatmul.mubr.f32.gmra.mrb[6].mxu1 %v1210_v25 }
 0x2e8   : > { %1684 = vmatprep.mubr.msk.f32.mxu1 %vm2084_vm11, %v2078_v0 }
 0x2eb   : > { %1685 = vmatmul.mubr.f32.gmra.mrb[8].mxu1 %v1211_v40 }
 0x3ae   : > { %v1373_v44 = vpop.f32.mrb[0].mxu1 }
 0x3af   : > { %1397 = vst [vmem:[%s217_s26] sm:$0xff] %v1373_v44  ;;  %v1674_v48 = vpop.f32.mrb[1].mxu1 }
 0x3b2   : > { %v1378_v31 = vpop.f32.mrb[2].mxu1 }
 0x3b3   : > { %1398 = vst [vmem:[%s217_s26 + $0x8] sm:$0xff] %v1378_v31  ;;  %v1677_v1 = vpop.f32.mrb[3].mxu1 }
 0x3b6   : > { %v1383_v21 = vpop.f32.mrb[4].mxu1 }
 0x3b7   : > { %1399 = vst [vmem:[%s217_s26 + $0x10] sm:$0xff] %v1383_v21  ;;  %v1680_v61 = vpop.f32.mrb[5].mxu1 }
 0x3ba   : > { %v1388_v36 = vpop.f32.mrb[6].mxu1 }
 0x3bb   : > { %1400 = vst [vmem:[%s217_s26 + $0x18] sm:$0xff] %v1388_v36  ;;  %v1683_v0 = vpop.f32.mrb[7].mxu1 }
 0x3be   : > { %v1393_v57 = vpop.f32.mrb[8].mxu1 }
 0x3bf   : > { %1401 = vst [vmem:[%s217_s26 + $0x20] sm:$0xff] %v1393_v57  ;;  %v1686_v59 = vpop.f32.mrb[9].mxu1 }
 0x3c0   : > { %2012 = shalt.err (!%p2009_p2)
}
 0x3c1   : > { %s2013_s5 = scalar_lea.hbm %s2784_s21, 640  ;;  %s2017_s18 = scalar_lea.hbm %s2831_s3, 1280 }
 0x3c2   : > { %p2014_p13 = scmp.ne.s32.totalorder %s2784_s21, %s2013_s5  ;;  %p2018_p4 = scmp.lt.u32.totalorder %s2784_s21, %s2831_s3 }
 0x3c3   : > { %p2019_p7 = scmp.lt.u32.totalorder %s2017_s18, %s2013_s5  ;;  %p2021_p11 = scmp.lt.u32.totalorder %s2013_s5, %s2784_s21 }
 0x3c4   : > { %p2015_p6 = pnand %p2014_p13, %p2845_p0 }
 0x3c5   : > { %p2020_p8 = por %p2019_p7, %p2018_p4 }
 0x3c6   : > { %p2016_p10 = pneg %p2015_p6 }
 0x3c7   : > { %p2022_p1 = por %p2021_p11, %p2020_p8 }
 0x3c9   : > { %p2023_p3 = pnand %p2022_p1, %p2016_p10 }
 0x3cb   : > { %2026 = shalt.err (!%p2023_p3)
}
 0x3cc   : > { %s2086_s30 = smov 128   ;;  %s2087_s26 = smov 8  }
 0x3cd   : > { %1821 = dma.vmem_to_hbm [thread:$0]  (%p2845_p0), %s2779_s28, 640, %s2784_s21, %s1403_s10, %s2086_s30, %s2086_s30, %s2087_s26  }
 0x3ce PF: > { %s1431_s22 = sand.u32 1, %s2057_s12   ;;  %p2846_p5 = scmp.ne.s32.totalorder %s2836_s19, 0 }
 0x3cf   : > { %p2847_p9 = scmp.ge.s32.totalorder %s2069_s15, 2  ;;  %s1432_s8 = scalar_lea.sflag [#allocation4], %s1431_s22 }
 0x3d1   : > { %p1835_p12 = pnand %p2847_p9, %p2846_p5 }
 0x3d3   : > { %2052 = dma.done.wait (!%p1835_p12), %s1432_s8, 640  }
 0x3d4   : > { %2054 = vsyncadd (!%p1835_p12), %s1432_s8, 4294966656  ;;  %p17_p2 = scmp.ge.s32.totalorder %s2221_s6, 4   ;;  %s2848_s12 = smov %s2061_s13 }
 0x3d5   : > { %s2849_s13 = smov %s2065_s14  ;;  %s2850_s14 = smov %s2230_s9 }
 0x3d6   : > { %s2851_s15 = smov %s2221_s6  ;;  %19 = sbr.rel (!%p17_p2) target bundleno = 6 (0x6), region = 85 }
 0x3dd   :  { %1437 = vsyncpa [#allocation3], 1 }
 0x3de   :  { %1439 = vsyncpa [#allocation3 + $0x1], 1 }
 0x3df   :  { %1440 = vsyncpa [#allocation6], 1 }
 0x3e0   :  { %1441 = vsyncpa [#allocation4], 1 }
 0x3e1   :  { %1443 = vsyncpa [#allocation4 + $0x1], 1 }

</bundles_post_ra>
